<compile_context>
chip_gen: v7x
topology: tpu7x:2x2x1
jax: 0.10.0
libtpu: 0.0.40
codegen_flags: <defaults>
</compile_context>

<pallas_src>
import functools

import jax
import jax.numpy as jnp
from jax.experimental import pallas as pl
from jax.experimental.pallas import tpu as pltpu

POOLING_SIZE = 7            # cfg.POOLING_SIZE
SPATIAL_SCALE = 1.0 / 16.0  # RoIAlignAvg(cfg.POOLING_SIZE, cfg.POOLING_SIZE, 1/16)
VMEM_LIMIT_BYTES = 32 * 1024 * 1024  # explicit scoped-VMEM budget (safe on v5e/v6e/v7x)


def _round_up(x, m):
    return ((x + m - 1) // m) * m


# ----------------------------------------------------------------------------
# 1) Generic tiled matmul: Y = act(X @ W + b), bf16 MXU inputs, f32 accumulator
# ----------------------------------------------------------------------------
def _matmul_kernel(x_ref, w_ref, b_ref, o_ref, acc_ref, *, act):
    @pl.when(pl.program_id(2) == 0)
    def _init():
        acc_ref[...] = jnp.zeros_like(acc_ref)

    acc_ref[...] += jnp.dot(x_ref[...].astype(jnp.bfloat16), w_ref[...],
                            preferred_element_type=jnp.float32)

    @pl.when(pl.program_id(2) == pl.num_programs(2) - 1)
    def _done():
        y = acc_ref[...] + b_ref[...]
        if act == "relu":
            y = jnp.maximum(y, 0.0)
        o_ref[...] = y.astype(o_ref.dtype)


def pallas_matmul(x, w_bf16, b, act="none", tm_max=256, tn_max=256, tk_max=512):
    """x: (M, K) f32, w: (K, N) bf16, b: (N,) f32 -> (M, N) f32."""
    M, K = x.shape
    Kw, N = w_bf16.shape
    assert K == Kw
    tm = min(tm_max, _round_up(M, 8))
    tn = min(tn_max, _round_up(N, 128))      # lane-dense output tiles
    tk = K if K <= tk_max else tk_max
    Mp, Np, Kp = _round_up(M, tm), _round_up(N, tn), _round_up(K, tk)

    xp = x if (Mp == M and Kp == K) else jnp.pad(x, ((0, Mp - M), (0, Kp - K)))
    wp = w_bf16 if (Kp == K and Np == N) else jnp.pad(w_bf16, ((0, Kp - K), (0, Np - N)))
    bp = b.reshape(1, N).astype(jnp.float32)
    if Np != N:
        bp = jnp.pad(bp, ((0, 0), (0, Np - N)))

    out = pl.pallas_call(
        functools.partial(_matmul_kernel, act=act),
        out_shape=jax.ShapeDtypeStruct((Mp, Np), jnp.float32),
        grid=(Mp // tm, Np // tn, Kp // tk),
        in_specs=[
            pl.BlockSpec((tm, tk), lambda i, j, k: (i, k)),
            pl.BlockSpec((tk, tn), lambda i, j, k: (k, j)),
            pl.BlockSpec((1, tn), lambda i, j, k: (0, j)),
        ],
        out_specs=pl.BlockSpec((tm, tn), lambda i, j, k: (i, j)),
        scratch_shapes=[pltpu.VMEM((tm, tn), jnp.float32)],
        compiler_params=pltpu.CompilerParams(
            dimension_semantics=("parallel", "parallel", "arbitrary"),
            vmem_limit_bytes=VMEM_LIMIT_BYTES),
    )(xp, wp, bp)
    return out[:M, :N]


# ----------------------------------------------------------------------------
# 2) 3x3 'same' conv, stride 1: in-kernel im2col (tap loop) — no 9x HBM blowup
# ----------------------------------------------------------------------------
def _conv_tap_kernel(x_ref, w_ref, b_ref, o_ref, *, H, W, KH, KW, relu):
    cin = x_ref.shape[-1]
    cout = o_ref.shape[-1]
    acc = jnp.zeros((H * W, cout), jnp.float32)
    for i in range(KH):
        for j in range(KW):
            xt = x_ref[0, i:i + H, j:j + W, :]
            xt = xt.reshape(H * W, cin).astype(jnp.bfloat16)
            acc = acc + jnp.dot(xt, w_ref[i * KW + j],
                                preferred_element_type=jnp.float32)
    y = acc + b_ref[...]
    if relu:
        y = jnp.maximum(y, 0.0)
    o_ref[...] = y.reshape(1, H, W, cout)


def conv3x3_pallas(x_nhwc, wtap_bf16, b, *, relu):
    """x: (B,H,W,Cin) f32; wtap: (KH*KW, Cin, Cout) bf16; b: (Cout,) f32."""
    B, H, W, cin = x_nhwc.shape
    KK, cin2, cout = wtap_bf16.shape
    assert cin == cin2
    KH = KW = int(round(KK ** 0.5))
    pad = KH // 2
    xp = jnp.pad(x_nhwc, ((0, 0), (pad, pad), (pad, pad), (0, 0)))
    b2 = b.reshape(1, cout).astype(jnp.float32)
    return pl.pallas_call(
        functools.partial(_conv_tap_kernel, H=H, W=W, KH=KH, KW=KW, relu=relu),
        out_shape=jax.ShapeDtypeStruct((B, H, W, cout), jnp.float32),
        grid=(B,),
        in_specs=[
            pl.BlockSpec((1, H + 2 * pad, W + 2 * pad, cin), lambda bb: (bb, 0, 0, 0)),
            pl.BlockSpec((KK, cin, cout), lambda bb: (0, 0, 0)),
            pl.BlockSpec((1, cout), lambda bb: (0, 0)),
        ],
        out_specs=pl.BlockSpec((1, H, W, cout), lambda bb: (bb, 0, 0, 0)),
        compiler_params=pltpu.CompilerParams(
            dimension_semantics=("parallel",),
            vmem_limit_bytes=VMEM_LIMIT_BYTES),
    )(xp, wtap_bf16, b2)


def conv1x1_pallas(x_nhwc, w_bf16, b, *, relu):
    B, H, W, cin = x_nhwc.shape
    cout = w_bf16.shape[1]
    y = pallas_matmul(x_nhwc.reshape(B * H * W, cin), w_bf16, b,
                      act="relu" if relu else "none")
    return y.reshape(B, H, W, cout)


# ----------------------------------------------------------------------------
# 3) netD_ds: two chained 1x1 convs (ReLU between) in a single kernel
# ----------------------------------------------------------------------------
def _fused_mlp2_kernel(x_ref, w1_ref, b1_ref, w2_ref, b2_ref, o_ref):
    h = jnp.dot(x_ref[...].astype(jnp.bfloat16), w1_ref[...],
                preferred_element_type=jnp.float32) + b1_ref[...]
    h = jnp.maximum(h, 0.0)
    o_ref[...] = jnp.dot(h.astype(jnp.bfloat16), w2_ref[...],
                         preferred_element_type=jnp.float32) + b2_ref[...]


def netD_ds_pallas(x_nhwc, d1, d2):
    """grad_reverse is identity in the forward pass; then conv1x1 -> ReLU -> conv1x1."""
    w1, b1 = d1
    w2, b2 = d2
    B, H, W, cin = x_nhwc.shape
    c1, c2 = w1.shape[1], w2.shape[1]
    M = B * H * W
    tm = min(256, _round_up(M, 8))
    Mp = _round_up(M, tm)
    x = x_nhwc.reshape(M, cin)
    xp = x if Mp == M else jnp.pad(x, ((0, Mp - M), (0, 0)))
    out = pl.pallas_call(
        _fused_mlp2_kernel,
        out_shape=jax.ShapeDtypeStruct((Mp, c2), jnp.float32),
        grid=(Mp // tm,),
        in_specs=[
            pl.BlockSpec((tm, cin), lambda i: (i, 0)),
            pl.BlockSpec((cin, c1), lambda i: (0, 0)),
            pl.BlockSpec((1, c1), lambda i: (0, 0)),
            pl.BlockSpec((c1, c2), lambda i: (0, 0)),
            pl.BlockSpec((1, c2), lambda i: (0, 0)),
        ],
        out_specs=pl.BlockSpec((tm, c2), lambda i: (i, 0)),
        compiler_params=pltpu.CompilerParams(
            dimension_semantics=("parallel",),
            vmem_limit_bytes=VMEM_LIMIT_BYTES),
    )(xp, w1, b1.reshape(1, c1).astype(jnp.float32),
      w2, b2.reshape(1, c2).astype(jnp.float32))
    return out[:M].reshape(B, H, W, c2)


# ----------------------------------------------------------------------------
# 4) RoIAlignAvg as a Pallas kernel (scalar-prefetched roi table, one-hot gather)
# ----------------------------------------------------------------------------
def _roi_align_kernel(bidx_ref, boxes_ref, feat_ref, o_ref, *, H, W, C, P, scale):
    r = pl.program_id(0)
    x1 = boxes_ref[r, 1] * scale
    y1 = boxes_ref[r, 2] * scale
    x2 = boxes_ref[r, 3] * scale
    y2 = boxes_ref[r, 4] * scale

    G = P + 1                              # RoIAlignAvg samples a (P+1)x(P+1) grid
    roi_w = jnp.maximum(x2 - x1 + 1.0, 0.0)  # legacy (+1)-width convention (scaled units)
    roi_h = jnp.maximum(y2 - y1 + 1.0, 0.0)
    bin_h = roi_h / (G - 1.0)
    bin_w = roi_w / (G - 1.0)

    ii = jax.lax.broadcasted_iota(jnp.int32, (G * G, 1), 0)
    gy = (ii // G).astype(jnp.float32)
    gx = (ii % G).astype(jnp.float32)
    hh = y1 + gy * bin_h
    ww = x1 + gx * bin_w

    valid = (hh >= 0.0) & (hh < H) & (ww >= 0.0) & (ww < W)
    h0 = jnp.clip(jnp.floor(hh), 0.0, H - 2.0)
    w0 = jnp.clip(jnp.floor(ww), 0.0, W - 2.0)
    lh = hh - h0
    lw = ww - w0
    vf = valid.astype(jnp.float32)
    c00 = (1.0 - lh) * (1.0 - lw) * vf
    c01 = (1.0 - lh) * lw * vf
    c10 = lh * (1.0 - lw) * vf
    c11 = lh * lw * vf

    h0i = h0.astype(jnp.int32)
    w0i = w0.astype(jnp.int32)
    i00 = h0i * W + w0i
    i01 = i00 + 1
    i10 = i00 + W
    i11 = i10 + 1

    # one-hot bilinear gather matrix -> a single MXU matmul instead of scalar gathers
    idx = jax.lax.broadcasted_iota(jnp.int32, (G * G, H * W), 1)
    gmat = ((idx == i00).astype(jnp.float32) * c00 +
            (idx == i01).astype(jnp.float32) * c01 +
            (idx == i10).astype(jnp.float32) * c10 +
            (idx == i11).astype(jnp.float32) * c11)

    feat = feat_ref[...].reshape(H * W, C)
    samples = jnp.dot(gmat, feat, preferred_element_type=jnp.float32)   # (G*G, C)
    s = samples.reshape(G, G, C)
    pooled = 0.25 * (s[:-1, :-1, :] + s[:-1, 1:, :] + s[1:, :-1, :] + s[1:, 1:, :])
    o_ref[...] = pooled.reshape(1, P, P, C)


def roi_align_pallas(feat_nhwc, rois_flat, pool_size, spatial_scale):
    """feat: (B,H,W,C) f32; rois: (R,5) [batch_idx,x1,y1,x2,y2] image coords."""
    B, H, W, C = feat_nhwc.shape
    R = rois_flat.shape[0]
    batch_idx = rois_flat[:, 0].astype(jnp.int32)
    return pl.pallas_call(
        functools.partial(_roi_align_kernel, H=H, W=W, C=C, P=pool_size,
                          scale=spatial_scale),
        out_shape=jax.ShapeDtypeStruct((R, pool_size, pool_size, C), jnp.float32),
        grid_spec=pltpu.PrefetchScalarGridSpec(
            num_scalar_prefetch=2,
            grid=(R,),
            in_specs=[pl.BlockSpec((1, H, W, C),
                                   lambda r, bidx, boxes: (bidx[r], 0, 0, 0))],
            out_specs=pl.BlockSpec((1, pool_size, pool_size, C),
                                   lambda r, bidx, boxes: (r, 0, 0, 0)),
        ),
        compiler_params=pltpu.CompilerParams(
            dimension_semantics=("arbitrary",),
            vmem_limit_bytes=VMEM_LIMIT_BYTES),
    )(batch_idx, rois_flat.astype(jnp.float32), feat_nhwc)


# ----------------------------------------------------------------------------
# 5) Fused RoI head: both branches + softmax + get_prototypes in one kernel
# ----------------------------------------------------------------------------
def _fused_head_kernel(xdi_ref, xb_ref,
                       w1d_ref, b1d_ref, w2d_ref, b2d_ref, w3d_ref, b3d_ref,
                       w1b_ref, b1b_ref, w2b_ref, b2b_ref, w3b_ref, b3b_ref,
                       odi_ref, ob_ref, proto_ref, *, n_classes):
    nb = 4 * n_classes

    def branch(x_ref, w1, b1, w2, b2, w3, b3):
        h = jnp.dot(x_ref[...].astype(jnp.bfloat16), w1[...],
                    preferred_element_type=jnp.float32) + b1[...]
        h = jnp.maximum(h, 0.0)
        h = jnp.dot(h.astype(jnp.bfloat16), w2[...],
                    preferred_element_type=jnp.float32) + b2[...]
        h = jnp.maximum(h, 0.0)
        y = jnp.dot(h.astype(jnp.bfloat16), w3[...],
                    preferred_element_type=jnp.float32) + b3[...]
        return h, y

    h_di, y_di = branch(xdi_ref, w1d_ref, b1d_ref, w2d_ref, b2d_ref, w3d_ref, b3d_ref)
    h_b, y_b = branch(xb_ref, w1b_ref, b1b_ref, w2b_ref, b2b_ref, w3b_ref, b3b_ref)

    def softmax(z):
        m = jnp.max(z, axis=-1, keepdims=True)
        e = jnp.exp(z - m)
        return e / jnp.sum(e, axis=-1, keepdims=True)

    cls_di = softmax(y_di[:, nb:nb + n_classes])
    cls_b = softmax(y_b[:, nb:nb + n_classes])

    odi_ref[:, :nb] = y_di[:, :nb]
    odi_ref[:, nb:nb + n_classes] = cls_di
    ob_ref[:, :nb] = y_b[:, :nb]
    ob_ref[:, nb:nb + n_classes] = cls_b

    def row_argmax(p):  # first index attaining the row max (== torch/np argmax)
        rr, cc = p.shape
        col = jax.lax.broadcasted_iota(jnp.int32, (rr, cc), 1)
        mx = jnp.max(p, axis=-1, keepdims=True)
        return jnp.min(jnp.where(p == mx, col, cc), axis=-1, keepdims=True)

    label = row_argmax(cls_di) + row_argmax(cls_b)        # (Rp, 1) int32
    cls_tmp = (cls_di + cls_b) * 0.5
    tw = jnp.where(label == 2, cls_tmp[:, 1:2], 1.0)      # target_weight
    wm = jnp.where(label > 1, tw, 0.0)                    # get_prototypes mask
    proto = jnp.sum(h_di * wm, axis=0, keepdims=True)     # (1, Dh)
    wsum = jnp.sum(wm)
    # w == 0 -> prototypes stay zeros (matches the PyTorch fallback).
    proto_ref[...] = proto / jnp.where(wsum != 0.0, wsum, 1.0)


def fused_head_pallas(x_di, x_base, hp, n_classes):
    Rp, _ = x_di.shape
    Dh = hp["w2_di"].shape[0]
    No = 5 * n_classes

    def full(shape):
        n = len(shape)
        return pl.BlockSpec(shape, lambda i: (0,) * n)

    args = (x_di, x_base,
            hp["w1_di"], hp["b1_di"], hp["w2_di"], hp["b2_di"], hp["w3_di"], hp["b3_di"],
            hp["w1_base"], hp["b1_base"], hp["w2_base"], hp["b2_base"],
            hp["w3_base"], hp["b3_base"])
    return pl.pallas_call(
        functools.partial(_fused_head_kernel, n_classes=n_classes),
        out_shape=(jax.ShapeDtypeStruct((Rp, No), jnp.float32),
                   jax.ShapeDtypeStruct((Rp, No), jnp.float32),
                   jax.ShapeDtypeStruct((1, Dh), jnp.float32)),
        grid=(1,),
        in_specs=[full(a.shape) for a in args],
        out_specs=(full((Rp, No)), full((Rp, No)), full((1, Dh))),
        compiler_params=pltpu.CompilerParams(
            dimension_semantics=("arbitrary",),
            vmem_limit_bytes=VMEM_LIMIT_BYTES),
    )(*args)


# ----------------------------------------------------------------------------
# Parameters (deterministic, synthetic — shapes follow _fasterRCNN with a small
# stand-in backbone & heads).  Weights are stored pre-cast to bf16 (MXU inputs);
# biases stay f32.  Head fc1 rows follow the (h, w, c) flatten convention.
# ----------------------------------------------------------------------------
def init_params(key, n_classes=2, c1=16, c2=32, hidden=64, pool=POOLING_SIZE):
    ks = jax.random.split(key, 13)

    def conv_taps(k, cin, cout, ksz):
        w = jax.random.normal(k, (ksz * ksz, cin, cout), jnp.float32) * 0.01
        return w.astype(jnp.bfloat16), jnp.zeros((cout,), jnp.float32)

    def conv1x1(k, cin, cout):
        w = jax.random.normal(k, (cin, cout), jnp.float32) * 0.01
        return w.astype(jnp.bfloat16), jnp.zeros((cout,), jnp.float32)

    def fc(k, nin, nout, pad_in=None):
        w = jax.random.normal(k, (nin, nout), jnp.float32) * 0.01
        if pad_in is not None and pad_in > nin:
            w = jnp.pad(w, ((0, pad_in - nin), (0, 0)))
        return w.astype(jnp.bfloat16), jnp.zeros((1, nout), jnp.float32)

    k1 = c2 * pool * pool                # flattened pooled size, (h, w, c) order
    k1p = _round_up(k1, 128)             # K padded to a lane multiple for the head
    no = 5 * n_classes                   # fused [bbox(4*nc) | cls(nc)] output

    w1d, b1d = fc(ks[5], k1, hidden, pad_in=k1p)   # _head_to_tail_di
    w2d, b2d = fc(ks[6], hidden, hidden)
    w3d, b3d = fc(ks[9], hidden, no)               # [RCNN_bbox_pred_di | RCNN_cls_score_di]
    w1b, b1b = fc(ks[7], k1, hidden, pad_in=k1p)   # _head_to_tail_base
    w2b, b2b = fc(ks[8], hidden, hidden)
    w3b, b3b = fc(ks[11], hidden, no)              # [RCNN_bbox_pred_base | RCNN_cls_score_base]

    return {
        "n_classes": n_classes,
        "base1": conv_taps(ks[0], 3, c1, 3),       # RCNN_base1
        "base2": conv_taps(ks[1], c1, c2, 3),      # RCNN_base2 (dout_base_model = c2)
        "enc": conv1x1(ks[2], c2, c2),             # Encoder_Content (1x1)
        "d1": conv1x1(ks[3], c2, 16),              # netD_ds
        "d2": conv1x1(ks[4], 16, 2),
        "head": {
            "k1": k1, "k1p": k1p, "hidden": hidden,
            "w1_di": w1d, "b1_di": b1d, "w2_di": w2d, "b2_di": b2d,
            "w3_di": w3d, "b3_di": b3d,
            "w1_base": w1b, "b1_base": b1b, "w2_base": w2b, "b2_base": b2b,
            "w3_base": w3b, "b3_base": b3b,
        },
    }


# ----------------------------------------------------------------------------
# Forward: eval mode, phase=1, target=False, Fourier=False
# ----------------------------------------------------------------------------
def faster_rcnn_forward(params, im_data, im_info, gt_boxes, num_boxes, rois):
    _ = (im_info, gt_boxes, num_boxes)  # only consumed by the untranslated RPN path
    n_classes = params["n_classes"]
    head = params["head"]
    B = im_data.shape[0]

    x = jnp.transpose(im_data, (0, 2, 3, 1))  # NCHW -> NHWC once (lane dim = channels)

    base_feat1 = conv3x3_pallas(x, *params["base1"], relu=True)            # RCNN_base1
    base_feat = conv3x3_pallas(base_feat1, *params["base2"], relu=True)    # RCNN_base2
    base_feat_content = conv1x1_pallas(base_feat, *params["enc"], relu=False)  # Encoder_Content

    # domain_ds = netD_ds(grad_reverse(base_feat)); grad_reverse == identity fwd.
    domain_ds = netD_ds_pallas(base_feat, params["d1"], params["d2"])

    # TODO(synk): RCNN_rpn (anchor enumeration + NMS) and _ProposalTargetLayer have
    # no clean Pallas equivalent; rois are supplied externally (eval path).
    rpn_loss_cls = 0.0
    rpn_loss_bbox = 0.0
    rois_label = None

    rois_flat = rois.reshape(-1, 5)
    pooled_feat_di = roi_align_pallas(base_feat_content, rois_flat,
                                      POOLING_SIZE, SPATIAL_SCALE)
    pooled_feat = roi_align_pallas(base_feat, rois_flat,
                                   POOLING_SIZE, SPATIAL_SCALE)

    R = rois_flat.shape[0]
    Rp = _round_up(R, 8)
    k1, k1p = head["k1"], head["k1p"]

    def flat_pad(p):
        # flatten in (h, w, c) order; fc1 weights were generated in this convention
        # (loading PyTorch weights would permute fc1 rows once at init instead of a
        # per-roi NHWC->NCHW transpose here).
        f = p.reshape(R, k1)
        return jnp.pad(f, ((0, Rp - R), (0, k1p - k1)))

    out_di, out_base, proto = fused_head_pallas(flat_pad(pooled_feat_di),
                                                flat_pad(pooled_feat),
                                                head, n_classes)
    nb = 4 * n_classes
    bbox_pred_di = out_di[:R, :nb]
    cls_prob_di = out_di[:R, nb:]
    bbox_pred_base = out_base[:R, :nb]
    cls_prob_base = out_base[:R, nb:]
    prototypes = proto.reshape(-1)

    n_rois_per_img = rois.shape[1]
    cls_prob_list = [cls_prob_di.reshape(B, n_rois_per_img, -1),
                     cls_prob_base.reshape(B, n_rois_per_img, -1)]
    bbox_pred_list = [bbox_pred_di.reshape(B, n_rois_per_img, -1),
                      bbox_pred_base.reshape(B, n_rois_per_img, -1)]
    RCNN_loss_cls_list = [0.0, 0.0]    # eval mode
    RCNN_loss_bbox_list = [0.0, 0.0]   # eval mode

    # Returned feature maps follow the PyTorch NCHW convention.
    base_feat_content_nchw = jnp.transpose(base_feat_content, (0, 3, 1, 2))
    domain_ds_nchw = jnp.transpose(domain_ds, (0, 3, 1, 2))

    return (rois, cls_prob_list, bbox_pred_list, rpn_loss_cls, rpn_loss_bbox,
            RCNN_loss_cls_list, RCNN_loss_bbox_list, rois_label,
            base_feat_content_nchw, domain_ds_nchw, prototypes)


# ----------------------------------------------------------------------------
if __name__ == "__main__":
    key = jax.random.PRNGKey(0)
    k_im, k_p = jax.random.split(key)

    B, Cin, H, W = 2, 3, 16, 16
    n_classes = 2   # e.g. ('__background__', 'car')
    hidden = 64
    im_data = jax.random.normal(k_im, (B, Cin, H, W), jnp.float32)
    # im_info in "image" coordinates (stride-16 convention of the RoIAlign layer)
    im_info = jnp.array([[H * 16.0, W * 16.0, 1.0]] * B, jnp.float32)
    gt_boxes = jnp.zeros((B, 5, 5), jnp.float32)
    num_boxes = jnp.zeros((B,), jnp.int32)

    params = init_params(k_p, n_classes=n_classes, hidden=hidden)

    # deterministic rois: (B, R, 5) with [batch_idx, x1, y1, x2, y2] in image coords
    R_PER = 4
    rois_py = []
    for b in range(B):
        rr = []
        for r in range(R_PER):
            x1 = float((r * 31 + b * 17) % 120)
            y1 = float((r * 53 + b * 11) % 120)
            rr.append([float(b), x1, y1, x1 + 80.0 + 8.0 * r, y1 + 96.0 + 4.0 * r])
        rois_py.append(rr)
    rois = jnp.array(rois_py, jnp.float32)

    out = faster_rcnn_forward(params, im_data, im_info, gt_boxes, num_boxes, rois)
    (rois_o, cls_prob_list, bbox_pred_list, _, _, _, _, _,
     base_feat_content, domain_ds, prototypes) = out

    for t in (cls_prob_list[0], cls_prob_list[1], bbox_pred_list[0],
              bbox_pred_list[1], base_feat_content, domain_ds, prototypes):
        jax.block_until_ready(t)

    assert cls_prob_list[0].shape == (B, R_PER, n_classes)
    assert bbox_pred_list[0].shape == (B, R_PER, 4 * n_classes)
    assert base_feat_content.shape == (B, 32, H, W)
    assert domain_ds.shape == (B, 2, H, W)
    assert prototypes.shape == (hidden,)
    print("KERNEL_OK")
</pallas_src>

<mosaic_0001>
module attributes {stable_mosaic.version = 11 : i64} {
  func.func @_conv_tap_kernel(%arg0: i32, %arg1: memref<1x18x18x3xf32, #tpu.memory_space<vmem>>, %arg2: memref<9x3x16xbf16, #tpu.memory_space<vmem>>, %arg3: memref<1x16xf32, #tpu.memory_space<vmem>>, %arg4: memref<1x16x16x16xf32, #tpu.memory_space<vmem>>) attributes {dimension_semantics = [#tpu.dimension_semantics<parallel>], iteration_bounds = array<i64: 2>, scalar_prefetch = 0 : i64, scratch_operands = 0 : i64, tpu.core_type = #tpu.core_type<tc>, window_params = [{transform_indices = @transform_0, window_bounds = array<i64: 1, 18, 18, 3>}, {pipeline_mode = #tpu.pipeline_mode<synchronous>, transform_indices = @transform_1, window_bounds = array<i64: 9, 3, 16>}, {pipeline_mode = #tpu.pipeline_mode<synchronous>, transform_indices = @transform_2, window_bounds = array<i64: 1, 16>}, {transform_indices = @transform_3, window_bounds = array<i64: 1, 16, 16, 16>}]} {
    %cst = arith.constant 0.000000e+00 : f32
    %0 = vector.broadcast %cst : f32 to vector<256x16xf32>
    %c0 = arith.constant 0 : index
    %c0_0 = arith.constant 0 : index
    %c0_1 = arith.constant 0 : index
    %c0_2 = arith.constant 0 : index
    %1 = vector.load %arg1[%c0, %c0_0, %c0_1, %c0_2] : memref<1x18x18x3xf32, #tpu.memory_space<vmem>>, vector<1x16x16x3xf32>
    %2 = vector.shape_cast %1 : vector<1x16x16x3xf32> to vector<16x16x3xf32>
    %3 = vector.shape_cast %2 : vector<16x16x3xf32> to vector<256x3xf32>
    %4 = arith.truncf %3 : vector<256x3xf32> to vector<256x3xbf16>
    %c0_3 = arith.constant 0 : index
    %c0_4 = arith.constant 0 : index
    %c0_5 = arith.constant 0 : index
    %5 = vector.load %arg2[%c0_3, %c0_4, %c0_5] : memref<9x3x16xbf16, #tpu.memory_space<vmem>>, vector<1x3x16xbf16>
    %6 = vector.shape_cast %5 : vector<1x3x16xbf16> to vector<3x16xbf16>
    %cst_6 = arith.constant dense<0.000000e+00> : vector<256x16xf32>
    %7 = tpu.matmul %4, %6, %cst_6 {dimension_numbers = #tpu.dot_dimension_numbers<[1], [0], [0], [1], [0, 0, 1, 1], [], []>} : vector<256x3xbf16>, vector<3x16xbf16>, vector<256x16xf32> -> vector<256x16xf32>
    %8 = arith.addf %0, %7 : vector<256x16xf32>
    %c0_7 = arith.constant 0 : index
    %c0_8 = arith.constant 0 : index
    %c1 = arith.constant 1 : index
    %c0_9 = arith.constant 0 : index
    %9 = vector.load %arg1[%c0_7, %c0_8, %c1, %c0_9] : memref<1x18x18x3xf32, #tpu.memory_space<vmem>>, vector<1x16x16x3xf32>
    %10 = vector.shape_cast %9 : vector<1x16x16x3xf32> to vector<16x16x3xf32>
    %11 = vector.shape_cast %10 : vector<16x16x3xf32> to vector<256x3xf32>
    %12 = arith.truncf %11 : vector<256x3xf32> to vector<256x3xbf16>
    %c1_10 = arith.constant 1 : index
    %c0_11 = arith.constant 0 : index
    %c0_12 = arith.constant 0 : index
    %13 = vector.load %arg2[%c1_10, %c0_11, %c0_12] : memref<9x3x16xbf16, #tpu.memory_space<vmem>>, vector<1x3x16xbf16>
    %14 = vector.shape_cast %13 : vector<1x3x16xbf16> to vector<3x16xbf16>
    %cst_13 = arith.constant dense<0.000000e+00> : vector<256x16xf32>
    %15 = tpu.matmul %12, %14, %cst_13 {dimension_numbers = #tpu.dot_dimension_numbers<[1], [0], [0], [1], [0, 0, 1, 1], [], []>} : vector<256x3xbf16>, vector<3x16xbf16>, vector<256x16xf32> -> vector<256x16xf32>
    %16 = arith.addf %8, %15 : vector<256x16xf32>
    %c0_14 = arith.constant 0 : index
    %c0_15 = arith.constant 0 : index
    %c2 = arith.constant 2 : index
    %c0_16 = arith.constant 0 : index
    %17 = vector.load %arg1[%c0_14, %c0_15, %c2, %c0_16] : memref<1x18x18x3xf32, #tpu.memory_space<vmem>>, vector<1x16x16x3xf32>
    %18 = vector.shape_cast %17 : vector<1x16x16x3xf32> to vector<16x16x3xf32>
    %19 = vector.shape_cast %18 : vector<16x16x3xf32> to vector<256x3xf32>
    %20 = arith.truncf %19 : vector<256x3xf32> to vector<256x3xbf16>
    %c2_17 = arith.constant 2 : index
    %c0_18 = arith.constant 0 : index
    %c0_19 = arith.constant 0 : index
    %21 = vector.load %arg2[%c2_17, %c0_18, %c0_19] : memref<9x3x16xbf16, #tpu.memory_space<vmem>>, vector<1x3x16xbf16>
    %22 = vector.shape_cast %21 : vector<1x3x16xbf16> to vector<3x16xbf16>
    %cst_20 = arith.constant dense<0.000000e+00> : vector<256x16xf32>
    %23 = tpu.matmul %20, %22, %cst_20 {dimension_numbers = #tpu.dot_dimension_numbers<[1], [0], [0], [1], [0, 0, 1, 1], [], []>} : vector<256x3xbf16>, vector<3x16xbf16>, vector<256x16xf32> -> vector<256x16xf32>
    %24 = arith.addf %16, %23 : vector<256x16xf32>
    %c0_21 = arith.constant 0 : index
    %c1_22 = arith.constant 1 : index
    %c0_23 = arith.constant 0 : index
    %c0_24 = arith.constant 0 : index
    %25 = vector.load %arg1[%c0_21, %c1_22, %c0_23, %c0_24] : memref<1x18x18x3xf32, #tpu.memory_space<vmem>>, vector<1x16x16x3xf32>
    %26 = vector.shape_cast %25 : vector<1x16x16x3xf32> to vector<16x16x3xf32>
    %27 = vector.shape_cast %26 : vector<16x16x3xf32> to vector<256x3xf32>
    %28 = arith.truncf %27 : vector<256x3xf32> to vector<256x3xbf16>
    %c3 = arith.constant 3 : index
    %c0_25 = arith.constant 0 : index
    %c0_26 = arith.constant 0 : index
    %29 = vector.load %arg2[%c3, %c0_25, %c0_26] : memref<9x3x16xbf16, #tpu.memory_space<vmem>>, vector<1x3x16xbf16>
    %30 = vector.shape_cast %29 : vector<1x3x16xbf16> to vector<3x16xbf16>
    %cst_27 = arith.constant dense<0.000000e+00> : vector<256x16xf32>
    %31 = tpu.matmul %28, %30, %cst_27 {dimension_numbers = #tpu.dot_dimension_numbers<[1], [0], [0], [1], [0, 0, 1, 1], [], []>} : vector<256x3xbf16>, vector<3x16xbf16>, vector<256x16xf32> -> vector<256x16xf32>
    %32 = arith.addf %24, %31 : vector<256x16xf32>
    %c0_28 = arith.constant 0 : index
    %c1_29 = arith.constant 1 : index
    %c1_30 = arith.constant 1 : index
    %c0_31 = arith.constant 0 : index
    %33 = vector.load %arg1[%c0_28, %c1_29, %c1_30, %c0_31] : memref<1x18x18x3xf32, #tpu.memory_space<vmem>>, vector<1x16x16x3xf32>
    %34 = vector.shape_cast %33 : vector<1x16x16x3xf32> to vector<16x16x3xf32>
    %35 = vector.shape_cast %34 : vector<16x16x3xf32> to vector<256x3xf32>
    %36 = arith.truncf %35 : vector<256x3xf32> to vector<256x3xbf16>
    %c4 = arith.constant 4 : index
    %c0_32 = arith.constant 0 : index
    %c0_33 = arith.constant 0 : index
    %37 = vector.load %arg2[%c4, %c0_32, %c0_33] : memref<9x3x16xbf16, #tpu.memory_space<vmem>>, vector<1x3x16xbf16>
    %38 = vector.shape_cast %37 : vector<1x3x16xbf16> to vector<3x16xbf16>
    %cst_34 = arith.constant dense<0.000000e+00> : vector<256x16xf32>
    %39 = tpu.matmul %36, %38, %cst_34 {dimension_numbers = #tpu.dot_dimension_numbers<[1], [0], [0], [1], [0, 0, 1, 1], [], []>} : vector<256x3xbf16>, vector<3x16xbf16>, vector<256x16xf32> -> vector<256x16xf32>
    %40 = arith.addf %32, %39 : vector<256x16xf32>
    %c0_35 = arith.constant 0 : index
    %c1_36 = arith.constant 1 : index
    %c2_37 = arith.constant 2 : index
    %c0_38 = arith.constant 0 : index
    %41 = vector.load %arg1[%c0_35, %c1_36, %c2_37, %c0_38] : memref<1x18x18x3xf32, #tpu.memory_space<vmem>>, vector<1x16x16x3xf32>
    %42 = vector.shape_cast %41 : vector<1x16x16x3xf32> to vector<16x16x3xf32>
    %43 = vector.shape_cast %42 : vector<16x16x3xf32> to vector<256x3xf32>
    %44 = arith.truncf %43 : vector<256x3xf32> to vector<256x3xbf16>
    %c5 = arith.constant 5 : index
    %c0_39 = arith.constant 0 : index
    %c0_40 = arith.constant 0 : index
    %45 = vector.load %arg2[%c5, %c0_39, %c0_40] : memref<9x3x16xbf16, #tpu.memory_space<vmem>>, vector<1x3x16xbf16>
    %46 = vector.shape_cast %45 : vector<1x3x16xbf16> to vector<3x16xbf16>
    %cst_41 = arith.constant dense<0.000000e+00> : vector<256x16xf32>
    %47 = tpu.matmul %44, %46, %cst_41 {dimension_numbers = #tpu.dot_dimension_numbers<[1], [0], [0], [1], [0, 0, 1, 1], [], []>} : vector<256x3xbf16>, vector<3x16xbf16>, vector<256x16xf32> -> vector<256x16xf32>
    %48 = arith.addf %40, %47 : vector<256x16xf32>
    %c0_42 = arith.constant 0 : index
    %c2_43 = arith.constant 2 : index
    %c0_44 = arith.constant 0 : index
    %c0_45 = arith.constant 0 : index
    %49 = vector.load %arg1[%c0_42, %c2_43, %c0_44, %c0_45] : memref<1x18x18x3xf32, #tpu.memory_space<vmem>>, vector<1x16x16x3xf32>
    %50 = vector.shape_cast %49 : vector<1x16x16x3xf32> to vector<16x16x3xf32>
    %51 = vector.shape_cast %50 : vector<16x16x3xf32> to vector<256x3xf32>
    %52 = arith.truncf %51 : vector<256x3xf32> to vector<256x3xbf16>
    %c6 = arith.constant 6 : index
    %c0_46 = arith.constant 0 : index
    %c0_47 = arith.constant 0 : index
    %53 = vector.load %arg2[%c6, %c0_46, %c0_47] : memref<9x3x16xbf16, #tpu.memory_space<vmem>>, vector<1x3x16xbf16>
    %54 = vector.shape_cast %53 : vector<1x3x16xbf16> to vector<3x16xbf16>
    %cst_48 = arith.constant dense<0.000000e+00> : vector<256x16xf32>
    %55 = tpu.matmul %52, %54, %cst_48 {dimension_numbers = #tpu.dot_dimension_numbers<[1], [0], [0], [1], [0, 0, 1, 1], [], []>} : vector<256x3xbf16>, vector<3x16xbf16>, vector<256x16xf32> -> vector<256x16xf32>
    %56 = arith.addf %48, %55 : vector<256x16xf32>
    %c0_49 = arith.constant 0 : index
    %c2_50 = arith.constant 2 : index
    %c1_51 = arith.constant 1 : index
    %c0_52 = arith.constant 0 : index
    %57 = vector.load %arg1[%c0_49, %c2_50, %c1_51, %c0_52] : memref<1x18x18x3xf32, #tpu.memory_space<vmem>>, vector<1x16x16x3xf32>
    %58 = vector.shape_cast %57 : vector<1x16x16x3xf32> to vector<16x16x3xf32>
    %59 = vector.shape_cast %58 : vector<16x16x3xf32> to vector<256x3xf32>
    %60 = arith.truncf %59 : vector<256x3xf32> to vector<256x3xbf16>
    %c7 = arith.constant 7 : index
    %c0_53 = arith.constant 0 : index
    %c0_54 = arith.constant 0 : index
    %61 = vector.load %arg2[%c7, %c0_53, %c0_54] : memref<9x3x16xbf16, #tpu.memory_space<vmem>>, vector<1x3x16xbf16>
    %62 = vector.shape_cast %61 : vector<1x3x16xbf16> to vector<3x16xbf16>
    %cst_55 = arith.constant dense<0.000000e+00> : vector<256x16xf32>
    %63 = tpu.matmul %60, %62, %cst_55 {dimension_numbers = #tpu.dot_dimension_numbers<[1], [0], [0], [1], [0, 0, 1, 1], [], []>} : vector<256x3xbf16>, vector<3x16xbf16>, vector<256x16xf32> -> vector<256x16xf32>
    %64 = arith.addf %56, %63 : vector<256x16xf32>
    %c0_56 = arith.constant 0 : index
    %c2_57 = arith.constant 2 : index
    %c2_58 = arith.constant 2 : index
    %c0_59 = arith.constant 0 : index
    %65 = vector.load %arg1[%c0_56, %c2_57, %c2_58, %c0_59] : memref<1x18x18x3xf32, #tpu.memory_space<vmem>>, vector<1x16x16x3xf32>
    %66 = vector.shape_cast %65 : vector<1x16x16x3xf32> to vector<16x16x3xf32>
    %67 = vector.shape_cast %66 : vector<16x16x3xf32> to vector<256x3xf32>
    %68 = arith.truncf %67 : vector<256x3xf32> to vector<256x3xbf16>
    %c8 = arith.constant 8 : index
    %c0_60 = arith.constant 0 : index
    %c0_61 = arith.constant 0 : index
    %69 = vector.load %arg2[%c8, %c0_60, %c0_61] : memref<9x3x16xbf16, #tpu.memory_space<vmem>>, vector<1x3x16xbf16>
    %70 = vector.shape_cast %69 : vector<1x3x16xbf16> to vector<3x16xbf16>
    %cst_62 = arith.constant dense<0.000000e+00> : vector<256x16xf32>
    %71 = tpu.matmul %68, %70, %cst_62 {dimension_numbers = #tpu.dot_dimension_numbers<[1], [0], [0], [1], [0, 0, 1, 1], [], []>} : vector<256x3xbf16>, vector<3x16xbf16>, vector<256x16xf32> -> vector<256x16xf32>
    %72 = arith.addf %64, %71 : vector<256x16xf32>
    %c0_63 = arith.constant 0 : index
    %c0_64 = arith.constant 0 : index
    %73 = vector.load %arg3[%c0_63, %c0_64] : memref<1x16xf32, #tpu.memory_space<vmem>>, vector<1x16xf32>
    %74 = vector.broadcast %73 : vector<1x16xf32> to vector<256x16xf32>
    %75 = arith.addf %72, %74 : vector<256x16xf32>
    %cst_65 = arith.constant 0.000000e+00 : f32
    %76 = vector.broadcast %cst_65 : f32 to vector<256x16xf32>
    %77 = arith.maximumf %75, %76 : vector<256x16xf32>
    %78 = vector.shape_cast %77 : vector<256x16xf32> to vector<1x16x16x16xf32>
    %c0_66 = arith.constant 0 : index
    %c0_67 = arith.constant 0 : index
    %c0_68 = arith.constant 0 : index
    %c0_69 = arith.constant 0 : index
    %79 = vector.load %arg4[%c0_66, %c0_67, %c0_68, %c0_69] : memref<1x16x16x16xf32, #tpu.memory_space<vmem>>, vector<1x16x16x16xf32>
    tpu.vector_store %arg4[%c0_66, %c0_67, %c0_68, %c0_69], %78 {strides = array<i32>} : memref<1x16x16x16xf32, #tpu.memory_space<vmem>>, vector<1x16x16x16xf32>,
    return
  }
  func.func @transform_0(%arg0: i32) -> (i32, i32, i32, i32) {
    %c0_i32 = arith.constant 0 : i32
    %c0_i32_0 = arith.constant 0 : i32
    %c0_i32_1 = arith.constant 0 : i32
    %c0_i32_2 = arith.constant 0 : i32
    return %arg0, %c0_i32, %c0_i32_0, %c0_i32_1 : i32, i32, i32, i32
  }
  func.func @transform_1(%arg0: i32) -> (i32, i32, i32) {
    %c0_i32 = arith.constant 0 : i32
    %c0_i32_0 = arith.constant 0 : i32
    %c0_i32_1 = arith.constant 0 : i32
    %c0_i32_2 = arith.constant 0 : i32
    return %c0_i32, %c0_i32_0, %c0_i32_1 : i32, i32, i32
  }
  func.func @transform_2(%arg0: i32) -> (i32, i32) {
    %c0_i32 = arith.constant 0 : i32
    %c0_i32_0 = arith.constant 0 : i32
    %c0_i32_1 = arith.constant 0 : i32
    return %c0_i32, %c0_i32_0 : i32, i32
  }
  func.func @transform_3(%arg0: i32) -> (i32, i32, i32, i32) {
    %c0_i32 = arith.constant 0 : i32
    %c0_i32_0 = arith.constant 0 : i32
    %c0_i32_1 = arith.constant 0 : i32
    %c0_i32_2 = arith.constant 0 : i32
    return %arg0, %c0_i32, %c0_i32_0, %c0_i32_1 : i32, i32, i32, i32
  }
}

</mosaic_0001>

<bundles_post_ra>
// kernel: tpu_custom_call.1
= control target key start
LH: loop header
LB: loop body
LE: loop exit
PB: predicated region body
PF: predicated region fallthrough
CT: control target
= control target key end

     0   :  { %8 = vsyncpa [#allocation3], 0  ;;  %s4906_s0 = inlined_call_operand.vmem [shape: f32[2,18,18,3], index: 0, kind: input, shape index: {}]   ;;  %s4907_s1 = inlined_call_operand.vmem [shape: bf16[9,3,16], index: 1, kind: input, shape index: {}]   ;;  %s4908_s2 = inlined_call_operand.vmem [shape: f32[1,16], index: 2, kind: input, shape index: {}]   ;;  %s4909_s3 = inlined_call_operand.hbm [shape: f32[2,16,16,16], index: 3, kind: output, shape index: {}]  }
   0x1   :  { %10 = vsyncpa [#allocation3 + $0x1], 0  ;;  %s4143_s12 = smov 0   ;;  %s4145_s13 = smov 0  }
   0x2   :  { %s4147_s14 = smov 0   ;;  %s4149_s15 = smov 0  }
   0x3 LB: > { %s4164_s16 = sadd.s32 4294967295, %s4117_s15   ;;  %s2938_s17 = sadd.s32 4294967294, %s4117_s15   ;;  %s4117_s15 = sphi %s4149_s15, %s4915_s15   ;;  %s4113_s14 = sphi %s4147_s14, %s4914_s14   ;;  %s4109_s13 = sphi %s4145_s13, %s4913_s13   ;;  %s4105_s12 = sphi %s4143_s12, %s4912_s12  }
   0x4   : > { %s4168_s18 = sadd.s32 1, %s4117_s15   ;;  %s91_s19 = sadd.s32 1, %s4113_s14 }
   0x5   : > { %s88_s20 = ssub.s32 %s4117_s15, %s4168_s18  ;;  %p101_p0 = scmp.ne.s32.totalorder %s4113_s14, %s4109_s13 }
   0x6   : > { %p89_p1 = scmp.eq.s32.totalorder %s88_s20, 0  ;;  %p102_p2 = scmp.eq.s32.totalorder %s4164_s16, 1 }
   0x7   : > { %p107_p3 = scmp.ne.s32.totalorder %s4109_s13, %s4105_s12  ;;  %p108_p4 = scmp.eq.s32.totalorder %s2938_s17, 1 }
   0x8   : > { %s4179_s21 = scalar_select %p89_p1, %s4113_s14, %s91_s19  }
   0x9   : > { %p4181_p5 = por %p102_p2, %p101_p0  ;;  %p4185_p6 = por %p108_p4, %p107_p3 }
   0xa   : > { %p2941_p7 = scmp.ge.s32.totalorder %s4117_s15, 1  ;;  %p140_p8 = scmp.lt.s32.totalorder %s4117_s15, 3 }
   0xc   : > { %p141_p9 = pnand %p2941_p7, %p140_p8 }
   0xd   : > { %v2944_v0 = vld [vmem:[%s4907_s1 + $0x2] sm:$0x3] (!%p141_p9)  ;;  %vm318_vm0 = vcmask (!%p141_p9), 1040384   ;;  %vm319_vm1 = vcmask (!%p141_p9), 1041408   ;;  %p164_p10 = scmp.lt.s32.totalorder (!%p141_p9), %s4164_s16, 1  ;;  %v4119_v1 = vmov (!%p141_p9), 65535  }
   0xe   : > { %144 = sbr.rel (%p141_p9) target bundleno = 547 (0x223), region = 32  ;;  %v320_v2 = vsel (!%p141_p9), %vm318_vm0, 4294967295, %v4119_v1  ;;  %v3075_v3 = vld [vmem:[%s4907_s1 + $0x8] sm:$0x3] (!%p141_p9)  ;;  %v218_v4 = vld [vmem:[%s4907_s1] sm:$0x3] (!%p141_p9) }
   0xf   : > { %v4201_v5 = vsel (!%p141_p9), %vm319_vm1, %v320_v2, 0  ;;  %v3124_v6 = vld [vmem:[%s4907_s1 + $0xa] sm:$0x3] (!%p141_p9)  ;;  %v3173_v11 = vld [vmem:[%s4907_s1 + $0xc] sm:$0x3] (!%p141_p9)  ;;  %vm269_vm2 = vcmask (!%p141_p9), 23552  }
  0x10   : > { %v323_v7 = vand.u32 (!%p141_p9), %v2944_v0, %v4201_v5  ;;  %v4209_v8 = vand.u32 (!%p141_p9), %v3075_v3, %v4201_v5  ;;  %v535_v9 = vand.u32 (!%p141_p9), %v4201_v5, %v218_v4  ;;  %v1680_v10 = vand.u32 (!%p141_p9), %v3124_v6, %v4201_v5  ;;  %v2977_v12 = vld [vmem:[%s4907_s1 + $0x4] sm:$0x3] (!%p141_p9)  ;;  %v3222_v54 = vld [vmem:[%s4907_s1 + $0xe] sm:$0x3] (!%p141_p9)  ;;  %s161_s29 = sand.u32 (!%p141_p9), 1, %s4109_s13   ;;  %s3294_s7 = sshll.u32 (!%p141_p9), %s4164_s16, 12 }
  0x11   : > { %v1975_v25 = vand.u32 (!%p141_p9), %v3173_v11, %v4201_v5  ;;  %v4243_v26 = vand.u32 (!%p141_p9), %v2977_v12, %v4201_v5  ;;  %v4320_v58 = vand.u32 (!%p141_p9), %v3222_v54, %v4201_v5  ;;  %s2942_s5 = sshll.u32 (!%p141_p9), %s161_s29, 8  ;;  %vm2829_vm3 = vcmask (!%p141_p9), 130048   ;;  %s4853_s11 = scalar_lea.hbm (!%p141_p9), %s4909_s3, %s3294_s7 }
  0x12   : > { %3448 = vmatprep.subr.bf16.mxu1 (!%p141_p9), %v323_v7  ;;  %3584 = vmatprep.subr.bf16.mxu0 (!%p141_p9), %v4209_v8  ;;  %s4120_s19 = smov (!%p141_p9), [#allocation2]  }
  0x13   : > { %3449 = vmatpush3.bf16.msra.mxu1 (!%p141_p9), %v323_v7  ;;  %3585 = vmatpush3.bf16.msra.mxu0 (!%p141_p9), %v4209_v8  ;;  %s4059_s20 = sshll.u32 (!%p141_p9), %s4120_s19, 4  ;;  %s4060_s20 = int_to_ptr.vmem [resolvable:$false] %s4059_s20 }
  0x14   : > { %3482 = vmatprep.subr.bf16.mxu1 (!%p141_p9), %v535_v9  ;;  %3618 = vmatprep.subr.bf16.mxu0 (!%p141_p9), %v1680_v10  ;;  %s4061_s24 = scalar_lea.vmem (!%p141_p9), %s4060_s20, 8192 }
  0x15   : > { %s165_s30 = scalar_select %p164_p10, %s4164_s16, 1 }
  0x16   : > { %s4865_s16 = scalar_lea.sflag [#allocation3], %s161_s29 }
  0x17   : > { %s4012_s6 = smul.u32 432, %s165_s30 }
  0x19   : > { %s4218_s9 = scalar_lea.vmem %s4906_s0, %s4012_s6  ;;  %s4756_s6 = scalar_lea.vmem [#allocation2], %s2942_s5 }
  0x1a   : > { %v219_v13 = vld [vmem:[%s4218_s9 + $0x1] sm:$0xff]  ;;  %v220_v14 = vld [vmem:[%s4218_s9 + $0x9] sm:$0xff]  ;;  %v3043_v15 = vld [vmem:[%s4218_s9 + $0x19] sm:$0xff]  ;;  %s2876_s8 = sshll.u32 %s4756_s6, 4  ;;  %s4855_s8 = int_to_ptr.vmem [resolvable:$true] %s2876_s8 }
  0x1b   : > { %v251_v16 = vpack.c.bf16 %v220_v14, %v219_v13  ;;  %v3044_v17 = vld [vmem:[%s4218_s9 + $0x21] sm:$0xff]  ;;  %v3045_v18 = vld [vmem:[%s4218_s9 + $0x31] sm:$0xff]  ;;  %v3046_v19 = vld [vmem:[%s4218_s9 + $0x39] sm:$0xff]  ;;  %s4055_s17 = scalar_lea.vmem %s4855_s8, 4096  ;;  %p4062_p0 = scmp.lt.s32.totalorder %s4855_s8, %s4060_s20 }
  0x1c   : > { %v1319_v20 = vpack.c.bf16 %v3044_v17, %v3043_v15  ;;  %v4232_v21 = vpack.c.bf16 %v3046_v19, %v3045_v18  ;;  %v3047_v22 = vld [vmem:[%s4218_s9 + $0x49] sm:$0xff]  ;;  %v3048_v23 = vld [vmem:[%s4218_s9 + $0x51] sm:$0xff]  ;;  %v3049_v27 = vld [vmem:[%s4218_s9 + $0x61] sm:$0xff]  ;;  %p4056_p11 = scmp.ne.s32.totalorder %s4855_s8, %s4055_s17  ;;  %p4063_p1 = scmp.lt.s32.totalorder %s4061_s24, %s4055_s17 }
  0x1d   : > { %3450 = vmatprep.mubr.msk.bf16.mxu1 %vm269_vm2, %v251_v16  ;;  %v4237_v24 = vpack.c.bf16 %v3048_v23, %v3047_v22  ;;  %v3050_v28 = vld [vmem:[%s4218_s9 + $0x69] sm:$0xff]  ;;  %v3051_v29 = vld [vmem:[%s4218_s9 + $0x79] sm:$0xff]  ;;  %v3052_v30 = vld [vmem:[%s4218_s9 + $0x81] sm:$0xff] }
  0x1e   : > { %3586 = vmatprep.mubr.msk.bf16.mxu0 %vm269_vm2, %v1319_v20  ;;  %3451 = vmatmul.mubr.msk.bf16.vlgmr.msra.gmra.mrb[0].mxu1 %vm269_vm2, %v1319_v20  ;;  %v4256_v31 = vpack.c.bf16 %v3050_v28, %v3049_v27  ;;  %v4258_v32 = vpack.c.bf16 %v3052_v30, %v3051_v29  ;;  %v3053_v33 = vld [vmem:[%s4218_s9 + $0x91] sm:$0xff]  ;;  %v3054_v34 = vld [vmem:[%s4218_s9 + $0x99] sm:$0xff]  ;;  %v3055_v35 = vld [vmem:[%s4218_s9 + $0xa9] sm:$0xff]  ;;  %p4057_p12 = pnand %p4056_p11, %p4181_p5  ;;  %p4064_p2 = por %p4063_p1, %p4062_p0 }
  0x1f   : > { %3483 = vmatpush3.bf16.msra.mxu1 %v535_v9  ;;  %3587 = vmatmul.mubr.msk.bf16.vlgmr.msra.gmra.mrb[0].mxu0 %vm269_vm2, %v4232_v21  ;;  %v3056_v36 = vld [vmem:[%s4218_s9 + $0xb1] sm:$0xff]  ;;  %v4272_v37 = vpack.c.bf16 %v3054_v34, %v3053_v33  ;;  %v3057_v39 = vld [vmem:[%s4218_s9 + $0xc1] sm:$0xff]  ;;  %v3058_v40 = vld [vmem:[%s4218_s9 + $0xc9] sm:$0xff] }
  0x20   : > { %3619 = vmatpush3.bf16.msra.mxu0 %v1680_v10  ;;  %3454 = vmatprep.mubr.msk.bf16.mxu1 %vm269_vm2, %v4232_v21  ;;  %v4274_v38 = vpack.c.bf16 %v3056_v36, %v3055_v35  ;;  %v3092_v41 = vld [vmem:[%s4218_s9 + $0x1a] sm:$0xff]  ;;  %v3093_v42 = vld [vmem:[%s4218_s9 + $0x22] sm:$0xff]  ;;  %v4288_v43 = vpack.c.bf16 %v3058_v40, %v3057_v39  ;;  %v3094_v47 = vld [vmem:[%s4218_s9 + $0x32] sm:$0xff]  ;;  %p4058_p13 = pneg %p4057_p12 }
  0x21   : > { %3590 = vmatprep.mubr.msk.bf16.mxu0 %vm269_vm2, %v4237_v24  ;;  %3652 = vmatprep.subr.bf16.mxu0 %v1975_v25  ;;  %v4290_v44 = vpack.c.bf16 %v3093_v42, %v3092_v41  ;;  %v237_v45 = vld [vmem:[%s4218_s9 + $0xd9] sm:$0xff]  ;;  %v238_v46 = vld [vmem:[%s4218_s9 + $0xe1] sm:$0xff]  ;;  %v239_v49 = vld [vmem:[%s4218_s9 + $0xf1] sm:$0xff] }
  0x22   : > { %3516 = vmatprep.subr.bf16.mxu1 %v4243_v26  ;;  %v3095_v48 = vld [vmem:[%s4218_s9 + $0x3a] sm:$0xff]  ;;  %v3096_v51 = vld [vmem:[%s4218_s9 + $0x4a] sm:$0xff]  ;;  %v3097_v52 = vld [vmem:[%s4218_s9 + $0x52] sm:$0xff]  ;;  %v4308_v53 = vpack.c.bf16 %v238_v46, %v237_v45  ;;  %p4065_p3 = pnand %p4064_p2, %p4058_p13 }
  0x23   : > { %v240_v50 = vld [vmem:[%s4218_s9 + $0xf9] sm:$0xff]  ;;  %v4313_v55 = vpack.c.bf16 %v3095_v48, %v3094_v47  ;;  %v4317_v57 = vpack.c.bf16 %v3097_v52, %v3096_v51  ;;  %v241_v59 = vld [vmem:[%s4218_s9 + $0x109] sm:$0xff]  ;;  %v242_v60 = vld [vmem:[%s4218_s9 + $0x111] sm:$0xff] }
  0x24   : > { %v4315_v56 = vpack.c.bf16 %v240_v50, %v239_v49  ;;  %v3098_v61 = vld [vmem:[%s4218_s9 + $0x62] sm:$0xff]  ;;  %v3099_v62 = vld [vmem:[%s4218_s9 + $0x6a] sm:$0xff]  ;;  %v3100_v1 = vld [vmem:[%s4218_s9 + $0x7a] sm:$0xff]  ;;  %v4339_v3 = vpack.c.bf16 %v242_v60, %v241_v59 }
  0x25   : > { %v243_v63 = vld [vmem:[%s4218_s9 + $0x121] sm:$0xff]  ;;  %v244_v0 = vld [vmem:[%s4218_s9 + $0x129] sm:$0xff]  ;;  %v4341_v4 = vpack.c.bf16 %v3099_v62, %v3098_v61  ;;  %v245_v9 = vld [vmem:[%s4218_s9 + $0x139] sm:$0xff] }
  0x26   : > { %3455 = vmatmul.mubr.msk.bf16.gmra.mrb[4].mxu1 %vm269_vm2, %v4237_v24  ;;  %v3101_v2 = vld [vmem:[%s4218_s9 + $0x82] sm:$0xff]  ;;  %v4343_v6 = vpack.c.bf16 %v244_v0, %v243_v63  ;;  %v3102_v11 = vld [vmem:[%s4218_s9 + $0x92] sm:$0xff]  ;;  %v3103_v12 = vld [vmem:[%s4218_s9 + $0x9a] sm:$0xff] }
  0x27   : > { %3591 = vmatmul.mubr.msk.bf16.gmra.mrb[4].mxu0 %vm269_vm2, %v4256_v31  ;;  %3458 = vmatprep.mubr.msk.bf16.mxu1 %vm269_vm2, %v4256_v31  ;;  %v4345_v7 = vpack.c.bf16 %v3101_v2, %v3100_v1  ;;  %v246_v10 = vld [vmem:[%s4218_s9 + $0x141] sm:$0xff]  ;;  %v247_v13 = vld [vmem:[%s4218_s9 + $0x151] sm:$0xff]  ;;  %v248_v14 = vld [vmem:[%s4218_s9 + $0x159] sm:$0xff]  ;;  %v4365_v18 = vpack.c.bf16 %v3103_v12, %v3102_v11 }
  0x28   : > { %3594 = vmatprep.mubr.msk.bf16.mxu0 %vm269_vm2, %v4258_v32  ;;  %v3104_v15 = vld [vmem:[%s4218_s9 + $0xaa] sm:$0xff]  ;;  %v3105_v16 = vld [vmem:[%s4218_s9 + $0xb2] sm:$0xff]  ;;  %v4363_v17 = vpack.c.bf16 %v246_v10, %v245_v9  ;;  %v4367_v19 = vpack.c.bf16 %v248_v14, %v247_v13  ;;  %v170_v28 = vld [vmem:[%s4218_s9] sm:$0xff] }
  0x29   : > { %v4369_v20 = vpack.c.bf16 %v3105_v16, %v3104_v15  ;;  %v249_v22 = vld [vmem:[%s4218_s9 + $0x169] sm:$0xff]  ;;  %v250_v23 = vld [vmem:[%s4218_s9 + $0x171] sm:$0xff]  ;;  %v3108_v30 = vld [vmem:[%s4218_s9 + $0xda] sm:$0xff] }
  0x2a   : > { %v3107_v27 = vld [vmem:[%s4218_s9 + $0xca] sm:$0xff]  ;;  %v3109_v33 = vld [vmem:[%s4218_s9 + $0xe2] sm:$0xff]  ;;  %v4387_v34 = vpack.c.bf16 %v250_v23, %v249_v22  ;;  %v172_v40 = vld [vmem:[%s4218_s9 + $0x18] sm:$0xff] }
  0x2b   : > { %v171_v29 = vld [vmem:[%s4218_s9 + $0x8] sm:$0xff]  ;;  %v4391_v39 = vpack.c.bf16 %v3109_v33, %v3108_v30  ;;  %v173_v41 = vld [vmem:[%s4218_s9 + $0x20] sm:$0xff]  ;;  %v3110_v42 = vld [vmem:[%s4218_s9 + $0xf2] sm:$0xff] }
  0x2c   : > { %v202_v36 = vpack.c.bf16 %v171_v29, %v170_v28  ;;  %v3111_v45 = vld [vmem:[%s4218_s9 + $0xfa] sm:$0xff]  ;;  %v174_v46 = vld [vmem:[%s4218_s9 + $0x30] sm:$0xff]  ;;  %v4408_v50 = vpack.c.bf16 %v173_v41, %v172_v40  ;;  %v3026_v51 = vld [vmem:[%s4907_s1 + $0x6] sm:$0x3] }
  0x2d   : > { %v175_v47 = vld [vmem:[%s4218_s9 + $0x38] sm:$0xff]  ;;  %v3112_v48 = vld [vmem:[%s4218_s9 + $0x10a] sm:$0xff]  ;;  %v4413_v52 = vpack.c.bf16 %v3111_v45, %v3110_v42  ;;  %v4420_v60 = vand.u32 %v3026_v51, %v4201_v5  ;;  %v3114_v63 = vld [vmem:[%s4218_s9 + $0x122] sm:$0xff] }
  0x2e   : > { %3459 = vmatmul.mubr.msk.bf16.gmra.mrb[8].mxu1 %vm269_vm2, %v4258_v32  ;;  %v3113_v49 = vld [vmem:[%s4218_s9 + $0x112] sm:$0xff]  ;;  %v4415_v54 = vpack.c.bf16 %v175_v47, %v174_v46  ;;  %v176_v61 = vld [vmem:[%s4218_s9 + $0x48] sm:$0xff]  ;;  %v178_v1 = vld [vmem:[%s4218_s9 + $0x60] sm:$0xff] }
  0x2f   : > { %3595 = vmatmul.mubr.msk.bf16.gmra.mrb[8].mxu0 %vm269_vm2, %v4272_v37  ;;  %3462 = vmatprep.mubr.msk.bf16.mxu1 %vm269_vm2, %v4272_v37  ;;  %v4417_v59 = vpack.c.bf16 %v3113_v49, %v3112_v48  ;;  %v177_v62 = vld [vmem:[%s4218_s9 + $0x50] sm:$0xff]  ;;  %v179_v2 = vld [vmem:[%s4218_s9 + $0x68] sm:$0xff]  ;;  %v180_v14 = vld [vmem:[%s4218_s9 + $0x78] sm:$0xff] }
  0x30   : > { %3598 = vmatprep.mubr.msk.bf16.mxu0 %vm269_vm2, %v4274_v38  ;;  %v3115_v0 = vld [vmem:[%s4218_s9 + $0x12a] sm:$0xff]  ;;  %v3117_v9 = vld [vmem:[%s4218_s9 + $0x142] sm:$0xff]  ;;  %v4440_v10 = vpack.c.bf16 %v177_v62, %v176_v61  ;;  %v4444_v12 = vpack.c.bf16 %v179_v2, %v178_v1  ;;  %v3118_v16 = vld [vmem:[%s4218_s9 + $0x152] sm:$0xff] }
  0x31   : > { %v4442_v11 = vpack.c.bf16 %v3115_v0, %v3114_v63  ;;  %v181_v15 = vld [vmem:[%s4218_s9 + $0x80] sm:$0xff]  ;;  %v182_v23 = vld [vmem:[%s4218_s9 + $0x90] sm:$0xff]  ;;  %v184_v40 = vld [vmem:[%s4218_s9 + $0xa8] sm:$0xff] }
  0x32   : > { %v3119_v22 = vld [vmem:[%s4218_s9 + $0x15a] sm:$0xff]  ;;  %v3121_v28 = vld [vmem:[%s4218_s9 + $0x172] sm:$0xff]  ;;  %v4464_v29 = vpack.c.bf16 %v181_v15, %v180_v14  ;;  %v3122_v42 = vld [vmem:[%s4218_s9 + $0x182] sm:$0xff] }
  0x33   : > { %v4466_v30 = vpack.c.bf16 %v3119_v22, %v3118_v16  ;;  %v185_v41 = vld [vmem:[%s4218_s9 + $0xb0] sm:$0xff]  ;;  %v186_v46 = vld [vmem:[%s4218_s9 + $0xc0] sm:$0xff]  ;;  %v187_v47 = vld [vmem:[%s4218_s9 + $0xc8] sm:$0xff] }
  0x34   : > { %v3123_v45 = vld [vmem:[%s4218_s9 + $0x18a] sm:$0xff]  ;;  %v4486_v48 = vpack.c.bf16 %v185_v41, %v184_v40  ;;  %v4490_v51 = vpack.c.bf16 %v187_v47, %v186_v46  ;;  %v188_v61 = vld [vmem:[%s4218_s9 + $0xd8] sm:$0xff]  ;;  %v189_v62 = vld [vmem:[%s4218_s9 + $0xe0] sm:$0xff] }
  0x35   : > { %v4488_v49 = vpack.c.bf16 %v3123_v45, %v3122_v42  ;;  %v190_v63 = vld [vmem:[%s4218_s9 + $0xf0] sm:$0xff]  ;;  %v191_v0 = vld [vmem:[%s4218_s9 + $0xf8] sm:$0xff]  ;;  %v4504_v1 = vpack.c.bf16 %v189_v62, %v188_v61  ;;  %v192_v14 = vld [vmem:[%s4218_s9 + $0x108] sm:$0xff] }
  0x36   : > { %3463 = vmatmul.mubr.msk.bf16.gmra.mrb[12].mxu1 %vm269_vm2, %v4274_v38  ;;  %v3271_v2 = vld [vmem:[%s4907_s1 + $0x10] sm:$0x3]  ;;  %v195_v16 = vld [vmem:[%s4218_s9 + $0x128] sm:$0xff] }
  0x37   : > { %3599 = vmatmul.mubr.msk.bf16.gmra.mrb[12].mxu0 %vm269_vm2, %v4288_v43  ;;  %3466 = vmatprep.mubr.msk.bf16.mxu1 %vm269_vm2, %v4288_v43  ;;  %v193_v15 = vld [vmem:[%s4218_s9 + $0x110] sm:$0xff]  ;;  %v200_v42 = vld [vmem:[%s4218_s9 + $0x168] sm:$0xff] }
  0x38   : > { %3620 = vmatprep.mubr.msk.bf16.mxu0 %vm269_vm2, %v4290_v44  ;;  %v4528_v22 = vpack.c.bf16 %v193_v15, %v192_v14  ;;  %v201_v45 = vld [vmem:[%s4218_s9 + $0x170] sm:$0xff]  ;;  %v698_v46 = vld [vmem:[%s4218_s9 + $0x2] sm:$0xff] }
  0x39   : > { %v699_v47 = vld [vmem:[%s4218_s9 + $0xa] sm:$0xff]  ;;  %v4560_v61 = vpack.c.bf16 %v201_v45, %v200_v42 }
  0x3a   : > { %v730_v62 = vpack.c.bf16 %v699_v47, %v698_v46 }
  0x3e   : > { %3467 = vmatmul.mubr.msk.bf16.gmra.mrb[16].mxu1 %vm269_vm2, %v4308_v53 }
  0x3f   : > { %3621 = vmatmul.mubr.msk.bf16.vlgmr.msra.gmra.mrb[0].mxu0 %vm269_vm2, %v4313_v55  ;;  %3470 = vmatprep.mubr.msk.bf16.mxu1 %vm269_vm2, %v4315_v56 }
  0x40   : > { %3653 = vmatpush3.bf16.msra.mxu0 %v1975_v25  ;;  %3624 = vmatprep.mubr.msk.bf16.mxu0 %vm269_vm2, %v4317_v57  ;;  %v3106_v25 = vld [vmem:[%s4218_s9 + $0xc2] sm:$0xff] }
  0x41   : > { %3686 = vmatprep.subr.bf16.mxu0 %v4320_v58  ;;  %v4389_v35 = vpack.c.bf16 %v3107_v27, %v3106_v25  ;;  %v183_v25 = vld [vmem:[%s4218_s9 + $0x98] sm:$0xff]  ;;  %v3120_v27 = vld [vmem:[%s4218_s9 + $0x16a] sm:$0xff] }
  0x42   : > { %v4468_v33 = vpack.c.bf16 %v183_v25, %v182_v23  ;;  %v197_v25 = vld [vmem:[%s4218_s9 + $0x140] sm:$0xff] }
  0x46   : > { %3471 = vmatmul.mubr.msk.bf16.gmra.mrb[20].mxu1 %vm269_vm2, %v4339_v3 }
  0x47   : > { %3625 = vmatmul.mubr.msk.bf16.gmra.mrb[4].mxu0 %vm269_vm2, %v4341_v4  ;;  %3474 = vmatprep.mubr.msk.bf16.mxu1 %vm269_vm2, %v4343_v6 }
  0x48   : > { %3628 = vmatprep.mubr.msk.bf16.mxu0 %vm269_vm2, %v4345_v7 }
  0x4e   : > { %3475 = vmatmul.mubr.msk.bf16.gmra.mrb[24].mxu1 %vm269_vm2, %v4363_v17 }
  0x4f   : > { %3629 = vmatmul.mubr.msk.bf16.gmra.mrb[8].mxu0 %vm269_vm2, %v4365_v18  ;;  %3478 = vmatprep.mubr.msk.bf16.mxu1 %vm269_vm2, %v4367_v19 }
  0x50   : > { %3632 = vmatprep.mubr.msk.bf16.mxu0 %vm269_vm2, %v4369_v20 }
  0x56   : > { %3479 = vmatmul.mubr.msk.bf16.gmra.mrb[28].mxu1 %vm269_vm2, %v4387_v34 }
  0x57   : > { %3633 = vmatmul.mubr.msk.bf16.gmra.mrb[12].mxu0 %vm269_vm2, %v4389_v35  ;;  %3484 = vmatprep.mubr.msk.bf16.mxu1 %vm269_vm2, %v202_v36  ;;  %v4470_v36 = vpack.c.bf16 %v3121_v28, %v3120_v27  ;;  %v198_v27 = vld [vmem:[%s4218_s9 + $0x150] sm:$0xff]  ;;  %v199_v28 = vld [vmem:[%s4218_s9 + $0x158] sm:$0xff] }
  0x58   : > { %3636 = vmatprep.mubr.msk.bf16.mxu0 %vm269_vm2, %v4391_v39  ;;  %v4546_v41 = vpack.c.bf16 %v199_v28, %v198_v27 }
  0x5e   : > { %3485 = vmatmul.mubr.msk.bf16.vlgmr.msra.gmra.mrb[0].mxu1 %vm269_vm2, %v4408_v50 }
  0x5f   : > { %3517 = vmatpush3.bf16.msra.mxu1 %v4243_v26  ;;  %3637 = vmatmul.mubr.msk.bf16.gmra.mrb[16].mxu0 %vm269_vm2, %v4413_v52  ;;  %v3116_v26 = vld [vmem:[%s4218_s9 + $0x13a] sm:$0xff] }
  0x60   : > { %3488 = vmatprep.mubr.msk.bf16.mxu1 %vm269_vm2, %v4415_v54  ;;  %3640 = vmatprep.mubr.msk.bf16.mxu0 %vm269_vm2, %v4417_v59  ;;  %v4446_v13 = vpack.c.bf16 %v3117_v9, %v3116_v26  ;;  %v4509_v26 = vpack.c.bf16 %v191_v0, %v190_v63  ;;  %v4512_v9 = vand.u32 %v3271_v2, %v4201_v5  ;;  %v194_v5 = vld [vmem:[%s4218_s9 + $0x120] sm:$0xff]  ;;  %v3171_v0 = vld [vmem:[%s4218_s9 + $0x198] sm:$0xff] }
  0x61   : > { %3550 = vmatprep.subr.bf16.mxu1 %v4420_v60  ;;  %v4530_v23 = vpack.c.bf16 %v195_v16, %v194_v5  ;;  %v3172_v2 = vld [vmem:[%s4218_s9 + $0x1a0] sm:$0xff] }
  0x62   : > { %v1923_v14 = vpack.c.bf16 %v3172_v2, %v3171_v0 }
  0x66   : > { %3489 = vmatmul.mubr.msk.bf16.gmra.mrb[4].mxu1 %vm269_vm2, %v4440_v10 }
  0x67   : > { %3641 = vmatmul.mubr.msk.bf16.gmra.mrb[20].mxu0 %vm269_vm2, %v4442_v11  ;;  %3492 = vmatprep.mubr.msk.bf16.mxu1 %vm269_vm2, %v4444_v12 }
  0x68   : > { %3644 = vmatprep.mubr.msk.bf16.mxu0 %vm269_vm2, %v4446_v13 }
  0x6e   : > { %3493 = vmatmul.mubr.msk.bf16.gmra.mrb[8].mxu1 %vm269_vm2, %v4464_v29 }
  0x6f   : > { %3645 = vmatmul.mubr.msk.bf16.gmra.mrb[24].mxu0 %vm269_vm2, %v4466_v30  ;;  %3496 = vmatprep.mubr.msk.bf16.mxu1 %vm269_vm2, %v4468_v33 }
  0x70   : > { %3648 = vmatprep.mubr.msk.bf16.mxu0 %vm269_vm2, %v4470_v36 }
  0x76   : > { %3497 = vmatmul.mubr.msk.bf16.gmra.mrb[12].mxu1 %vm269_vm2, %v4486_v48 }
  0x77   : > { %3649 = vmatmul.mubr.msk.bf16.gmra.mrb[28].mxu0 %vm269_vm2, %v4488_v49  ;;  %3500 = vmatprep.mubr.msk.bf16.mxu1 %vm269_vm2, %v4490_v51 }
  0x78   : > { %3654 = vmatprep.mubr.msk.bf16.mxu0 %vm269_vm2, %v4415_v54 }
  0x7e   : > { %3501 = vmatmul.mubr.msk.bf16.gmra.mrb[16].mxu1 %vm269_vm2, %v4504_v1 }
  0x7f   : > { %3655 = vmatmul.mubr.msk.bf16.vlgmr.msra.gmra.mrb[0].mxu0 %vm269_vm2, %v4440_v10  ;;  %3504 = vmatprep.mubr.msk.bf16.mxu1 %vm269_vm2, %v4509_v26 }
  0x80   : > { %3687 = vmatpush3.bf16.msra.mxu0 %v4320_v58  ;;  %3658 = vmatprep.mubr.msk.bf16.mxu0 %vm269_vm2, %v4444_v12  ;;  %v196_v58 = vld [vmem:[%s4218_s9 + $0x138] sm:$0xff] }
  0x81   : > { %3720 = vmatprep.subr.bf16.mxu0 %v4512_v9  ;;  %v4544_v40 = vpack.c.bf16 %v197_v25, %v196_v58 }
  0x86   : > { %3505 = vmatmul.mubr.msk.bf16.gmra.mrb[20].mxu1 %vm269_vm2, %v4528_v22 }
  0x87   : > { %3659 = vmatmul.mubr.msk.bf16.gmra.mrb[4].mxu0 %vm269_vm2, %v4464_v29  ;;  %3508 = vmatprep.mubr.msk.bf16.mxu1 %vm269_vm2, %v4530_v23 }
  0x88   : > { %3662 = vmatprep.mubr.msk.bf16.mxu0 %vm269_vm2, %v4468_v33 }
  0x8e   : > { %3509 = vmatmul.mubr.msk.bf16.gmra.mrb[24].mxu1 %vm269_vm2, %v4544_v40 }
  0x8f   : > { %3663 = vmatmul.mubr.msk.bf16.gmra.mrb[8].mxu0 %vm269_vm2, %v4486_v48  ;;  %3512 = vmatprep.mubr.msk.bf16.mxu1 %vm269_vm2, %v4546_v41 }
  0x90   : > { %3666 = vmatprep.mubr.msk.bf16.mxu0 %vm269_vm2, %v4490_v51 }
  0x96   : > { %3513 = vmatmul.mubr.msk.bf16.gmra.mrb[28].mxu1 %vm269_vm2, %v4560_v61 }
  0x97   : > { %3667 = vmatmul.mubr.msk.bf16.gmra.mrb[12].mxu0 %vm269_vm2, %v4504_v1  ;;  %3518 = vmatprep.mubr.msk.bf16.mxu1 %vm269_vm2, %v730_v62 }
  0x98   : > { %3670 = vmatprep.mubr.msk.bf16.mxu0 %vm269_vm2, %v4509_v26 }
  0x9e   : > { %3519 = vmatmul.mubr.msk.bf16.vlgmr.msra.gmra.mrb[0].mxu1 %vm269_vm2, %v4290_v44  ;;  %v3169_v44 = vld [vmem:[%s4218_s9 + $0x180] sm:$0xff] }
  0x9f   : > { %3551 = vmatpush3.bf16.msra.mxu1 %v4420_v60  ;;  %3671 = vmatmul.mubr.msk.bf16.gmra.mrb[16].mxu0 %vm269_vm2, %v4528_v22  ;;  %v3170_v60 = vld [vmem:[%s4218_s9 + $0x188] sm:$0xff] }
  0xa0   : > { %3522 = vmatprep.mubr.msk.bf16.mxu1 %vm269_vm2, %v4313_v55  ;;  %3674 = vmatprep.mubr.msk.bf16.mxu0 %vm269_vm2, %v4530_v23  ;;  %v4589_v63 = vpack.c.bf16 %v3170_v60, %v3169_v44 }
  0xa1   : > { %3754 = vmatprep.subr.bf16.mxu1 %v4209_v8 }
  0xa6   : > { %3523 = vmatmul.mubr.msk.bf16.gmra.mrb[4].mxu1 %vm269_vm2, %v4317_v57 }
  0xa7   : > { %3675 = vmatmul.mubr.msk.bf16.gmra.mrb[20].mxu0 %vm269_vm2, %v4544_v40  ;;  %3526 = vmatprep.mubr.msk.bf16.mxu1 %vm269_vm2, %v4341_v4 }
  0xa8   : > { %3678 = vmatprep.mubr.msk.bf16.mxu0 %vm269_vm2, %v4546_v41 }
  0xae   : > { %3527 = vmatmul.mubr.msk.bf16.gmra.mrb[8].mxu1 %vm269_vm2, %v4345_v7 }
  0xaf   : > { %3679 = vmatmul.mubr.msk.bf16.gmra.mrb[24].mxu0 %vm269_vm2, %v4560_v61  ;;  %3530 = vmatprep.mubr.msk.bf16.mxu1 %vm269_vm2, %v4365_v18 }
  0xb0   : > { %3682 = vmatprep.mubr.msk.bf16.mxu0 %vm269_vm2, %v4589_v63 }
  0xb6   : > { %3531 = vmatmul.mubr.msk.bf16.gmra.mrb[12].mxu1 %vm269_vm2, %v4369_v20 }
  0xb7   : > { %3683 = vmatmul.mubr.msk.bf16.gmra.mrb[28].mxu0 %vm269_vm2, %v1923_v14  ;;  %3534 = vmatprep.mubr.msk.bf16.mxu1 %vm269_vm2, %v4389_v35 }
  0xb8   : > { %3688 = vmatprep.mubr.msk.bf16.mxu0 %vm269_vm2, %v4232_v21  ;;  %v3219_v21 = vld [vmem:[%s4218_s9 + $0x189] sm:$0xff] }
  0xbe   : > { %3535 = vmatmul.mubr.msk.bf16.gmra.mrb[16].mxu1 %vm269_vm2, %v4391_v39 }
  0xbf   : > { %3689 = vmatmul.mubr.msk.bf16.vlgmr.msra.gmra.mrb[0].mxu0 %vm269_vm2, %v4237_v24  ;;  %3538 = vmatprep.mubr.msk.bf16.mxu1 %vm269_vm2, %v4413_v52 }
  0xc0   : > { %3721 = vmatpush3.bf16.msra.mxu0 %v4512_v9  ;;  %3692 = vmatprep.mubr.msk.bf16.mxu0 %vm269_vm2, %v4256_v31  ;;  %v3220_v31 = vld [vmem:[%s4218_s9 + $0x199] sm:$0xff] }
  0xc6   : > { %3539 = vmatmul.mubr.msk.bf16.gmra.mrb[20].mxu1 %vm269_vm2, %v4417_v59 }
  0xc7   : > { %3693 = vmatmul.mubr.msk.bf16.gmra.mrb[4].mxu0 %vm269_vm2, %v4258_v32  ;;  %3542 = vmatprep.mubr.msk.bf16.mxu1 %vm269_vm2, %v4442_v11  ;;  %v3221_v32 = vld [vmem:[%s4218_s9 + $0x1a1] sm:$0xff] }
  0xc8   : > { %3696 = vmatprep.mubr.msk.bf16.mxu0 %vm269_vm2, %v4272_v37  ;;  %v2217_v37 = vpack.c.bf16 %v3221_v32, %v3220_v31 }
  0xce   : > { %3543 = vmatmul.mubr.msk.bf16.gmra.mrb[24].mxu1 %vm269_vm2, %v4446_v13 }
  0xcf   : > { %3697 = vmatmul.mubr.msk.bf16.gmra.mrb[8].mxu0 %vm269_vm2, %v4274_v38  ;;  %3546 = vmatprep.mubr.msk.bf16.mxu1 %vm269_vm2, %v4466_v30  ;;  %v3269_v38 = vld [vmem:[%s4218_s9 + $0x19a] sm:$0xff] }
  0xd0   : > { %3700 = vmatprep.mubr.msk.bf16.mxu0 %vm269_vm2, %v4288_v43  ;;  %v3270_v43 = vld [vmem:[%s4218_s9 + $0x1a2] sm:$0xff] }
  0xd6   : > { %3547 = vmatmul.mubr.msk.bf16.gmra.mrb[28].mxu1 %vm269_vm2, %v4470_v36 }
  0xd7   : > { %3701 = vmatmul.mubr.msk.bf16.gmra.mrb[12].mxu0 %vm269_vm2, %v4308_v53  ;;  %3552 = vmatprep.mubr.msk.bf16.mxu1 %vm269_vm2, %v4408_v50 }
  0xd8   : > { %3704 = vmatprep.mubr.msk.bf16.mxu0 %vm269_vm2, %v4315_v56 }
  0xde   : > { %3553 = vmatmul.mubr.msk.bf16.vlgmr.msra.gmra.mrb[0].mxu1 %vm269_vm2, %v4415_v54 }
  0xdf   : > { %3755 = vmatpush3.bf16.msra.mxu1 %v4209_v8  ;;  %3705 = vmatmul.mubr.msk.bf16.gmra.mrb[16].mxu0 %vm269_vm2, %v4339_v3  ;;  %v3218_v8 = vld [vmem:[%s4218_s9 + $0x181] sm:$0xff] }
  0xe0   : > { %3556 = vmatprep.mubr.msk.bf16.mxu1 %vm269_vm2, %v4440_v10  ;;  %3708 = vmatprep.mubr.msk.bf16.mxu0 %vm269_vm2, %v4343_v6  ;;  %v2216_v24 = vpack.c.bf16 %v3219_v21, %v3218_v8 }
  0xe6   : > { %3557 = vmatmul.mubr.msk.bf16.gmra.mrb[4].mxu1 %vm269_vm2, %v4444_v12 }
  0xe7   : > { %3709 = vmatmul.mubr.msk.bf16.gmra.mrb[20].mxu0 %vm269_vm2, %v4363_v17  ;;  %3560 = vmatprep.mubr.msk.bf16.mxu1 %vm269_vm2, %v4464_v29 }
  0xe8   : > { %3712 = vmatprep.mubr.msk.bf16.mxu0 %vm269_vm2, %v4367_v19 }
  0xee   : > { %3561 = vmatmul.mubr.msk.bf16.gmra.mrb[8].mxu1 %vm269_vm2, %v4468_v33 }
  0xef   : > { %3713 = vmatmul.mubr.msk.bf16.gmra.mrb[24].mxu0 %vm269_vm2, %v4387_v34  ;;  %3564 = vmatprep.mubr.msk.bf16.mxu1 %vm269_vm2, %v4486_v48 }
  0xf0   : > { %3716 = vmatprep.mubr.msk.bf16.mxu0 %vm269_vm2, %v2216_v24 }
  0xf6   : > { %3565 = vmatmul.mubr.msk.bf16.gmra.mrb[12].mxu1 %vm269_vm2, %v4490_v51 }
  0xf7   : > { %3717 = vmatmul.mubr.msk.bf16.gmra.mrb[28].mxu0 %vm269_vm2, %v2217_v37  ;;  %3568 = vmatprep.mubr.msk.bf16.mxu1 %vm269_vm2, %v4504_v1 }
  0xf8   : > { %3722 = vmatprep.mubr.msk.bf16.mxu0 %vm269_vm2, %v4313_v55 }
  0xfe   : > { %3569 = vmatmul.mubr.msk.bf16.gmra.mrb[16].mxu1 %vm269_vm2, %v4509_v26 }
  0xff   : > { %3723 = vmatmul.mubr.msk.bf16.vlgmr.msra.gmra.mrb[0].mxu0 %vm269_vm2, %v4317_v57  ;;  %3572 = vmatprep.mubr.msk.bf16.mxu1 %vm269_vm2, %v4528_v22 }
 0x100   : > { %3726 = vmatprep.mubr.msk.bf16.mxu0 %vm269_vm2, %v4341_v4 }
 0x106   : > { %3573 = vmatmul.mubr.msk.bf16.gmra.mrb[20].mxu1 %vm269_vm2, %v4530_v23 }
 0x107   : > { %3727 = vmatmul.mubr.msk.bf16.gmra.mrb[4].mxu0 %vm269_vm2, %v4345_v7  ;;  %3576 = vmatprep.mubr.msk.bf16.mxu1 %vm269_vm2, %v4544_v40 }
 0x108   : > { %3730 = vmatprep.mubr.msk.bf16.mxu0 %vm269_vm2, %v4365_v18 }
 0x10e   : > { %3577 = vmatmul.mubr.msk.bf16.gmra.mrb[24].mxu1 %vm269_vm2, %v4546_v41 }
 0x10f   : > { %3731 = vmatmul.mubr.msk.bf16.gmra.mrb[8].mxu0 %vm269_vm2, %v4369_v20  ;;  %3580 = vmatprep.mubr.msk.bf16.mxu1 %vm269_vm2, %v4560_v61 }
 0x110   : > { %3734 = vmatprep.mubr.msk.bf16.mxu0 %vm269_vm2, %v4389_v35 }
 0x116   : > { %3581 = vmatmul.mubr.msk.bf16.gmra.mrb[28].mxu1 %vm269_vm2, %v4589_v63 }
 0x117   : > { %3735 = vmatmul.mubr.msk.bf16.gmra.mrb[12].mxu0 %vm269_vm2, %v4391_v39  ;;  %3602 = vmatprep.mubr.msk.bf16.mxu1 %vm269_vm2, %v4308_v53  ;;  %v2511_v53 = vpack.c.bf16 %v3270_v43, %v3269_v38 }
 0x118   : > { %3738 = vmatprep.mubr.msk.bf16.mxu0 %vm269_vm2, %v4413_v52 }
 0x11e   : > { %3603 = vmatmul.mubr.msk.bf16.vlgmr.msra.gmra.mrb[16].mxu1 %vm269_vm2, %v4315_v56 }
 0x11f   : > { %3739 = vmatmul.mubr.msk.bf16.gmra.mrb[16].mxu0 %vm269_vm2, %v4417_v59  ;;  %3606 = vmatprep.mubr.msk.bf16.mxu1 %vm269_vm2, %v4339_v3  ;;  %v4748_v59 = vld [vmem:[%s4908_s2] ss:$0 sm:$0xff] }
 0x120   : > { %3742 = vmatprep.mubr.msk.bf16.mxu0 %vm269_vm2, %v4442_v11 }
 0x126   : > { %3607 = vmatmul.mubr.msk.bf16.gmra.mrb[20].mxu1 %vm269_vm2, %v4343_v6 }
 0x127   : > { %3743 = vmatmul.mubr.msk.bf16.gmra.mrb[20].mxu0 %vm269_vm2, %v4446_v13  ;;  %3610 = vmatprep.mubr.msk.bf16.mxu1 %vm269_vm2, %v4363_v17 }
 0x128   : > { %3746 = vmatprep.mubr.msk.bf16.mxu0 %vm269_vm2, %v4466_v30 }
 0x12e   : > { %3611 = vmatmul.mubr.msk.bf16.gmra.mrb[24].mxu1 %vm269_vm2, %v4367_v19 }
 0x12f   : > { %3747 = vmatmul.mubr.msk.bf16.gmra.mrb[24].mxu0 %vm269_vm2, %v4470_v36  ;;  %3614 = vmatprep.mubr.msk.bf16.mxu1 %vm269_vm2, %v4387_v34 }
 0x130   : > { %3750 = vmatprep.mubr.msk.bf16.mxu0 %vm269_vm2, %v4488_v49 }
 0x136   : > { %3615 = vmatmul.mubr.msk.bf16.gmra.mrb[28].mxu1 %vm269_vm2, %v2216_v24 }
 0x137   : > { %3751 = vmatmul.mubr.msk.bf16.gmra.mrb[28].mxu0 %vm269_vm2, %v2511_v53 }
 0x1b1   : > { %v3554_v55 = vpop.f32.mrb[0].mxu1 }
 0x1b2   : > { %v1128_v56 = vpop.f32.mrb[1].mxu1 }
 0x1b3   : > { %v3555_v57 = vpop.f32.mrb[2].mxu1 }
 0x1b4   : > { %v1131_v3 = vpop.f32.mrb[3].mxu1 }
 0x1b9   : > { %v3558_v4 = vpop.f32.mrb[4].mxu1 }
 0x1ba   : > { %v1144_v6 = vpop.f32.mrb[5].mxu1 }
 0x1bb   : > { %v3559_v7 = vpop.f32.mrb[6].mxu1 }
 0x1bc   : > { %v1147_v17 = vpop.f32.mrb[7].mxu1 }
 0x1c1   : > { %v3562_v18 = vpop.f32.mrb[8].mxu1 }
 0x1c2   : > { %v1160_v19 = vpop.f32.mrb[9].mxu1 }
 0x1c3   : > { %v3563_v20 = vpop.f32.mrb[10].mxu1 }
 0x1c4   : > { %v1163_v34 = vpop.f32.mrb[11].mxu1 }
 0x1c9   : > { %v4736_v35 = vpop.f32.mrb[12].mxu1 }
 0x1ca   : > { %v4738_v39 = vpop.f32.mrb[13].mxu1 }
 0x1cb   : > { %v4740_v50 = vpop.f32.mrb[14].mxu1 }
 0x1cc   : > { %v4742_v52 = vpop.f32.mrb[15].mxu1 }
 0x1d2   : > { %v3724_v54 = vpop.f32.mrb[0].mxu0 }
 0x1d3   : > { %v3756_v10 = vadd.f32 %v3724_v54, %v3554_v55  ;;  %v2599_v11 = vpop.f32.mrb[1].mxu0 }
 0x1d4   : > { %v3757_v12 = vadd.f32 %v2599_v11, %v1128_v56  ;;  %v3725_v13 = vpop.f32.mrb[2].mxu0 }
 0x1d5   : > { %v2767_v29 = vadd.f32 %v3756_v10, %v4748_v59  ;;  %v3758_v30 = vadd.f32 %v3725_v13, %v3555_v57  ;;  %v2602_v33 = vpop.f32.mrb[3].mxu0 }
 0x1d6   : > { %v2765_v36 = vadd.f32 %v3757_v12, %v4748_v59  ;;  %v3759_v48 = vadd.f32 %v2602_v33, %v1131_v3 }
 0x1d7   : > { %v2799_v49 = vmax.f32 %v2767_v29, 0.0  ;;  %v2768_v51 = vadd.f32 %v3758_v30, %v4748_v59 }
 0x1d8   : > { %v2797_v1 = vmax.f32 %v2765_v36, 0.0  ;;  %v2766_v26 = vadd.f32 %v3759_v48, %v4748_v59 }
 0x1d9   : > { %2832 = vst.msk [vmem:[%s4756_s6 + $0x10] sm:$0xff] %vm2829_vm3, %v2799_v49  ;;  %v2800_v9 = vmax.f32 %v2768_v51, 0.0 }
 0x1da   : > { %2830 = vst.msk [vmem:[%s4756_s6] sm:$0xff] %vm2829_vm3, %v2797_v1  ;;  %v2798_v15 = vmax.f32 %v2766_v26, 0.0  ;;  %v3728_v5 = vpop.f32.mrb[4].mxu0 }
 0x1db   : > { %2833 = vst.msk [vmem:[%s4756_s6 + $0x18] sm:$0xff] %vm2829_vm3, %v2800_v9  ;;  %v3760_v16 = vadd.f32 %v3728_v5, %v3558_v4  ;;  %v2615_v22 = vpop.f32.mrb[5].mxu0 }
 0x1dc   : > { %2831 = vst.msk [vmem:[%s4756_s6 + $0x8] sm:$0xff] %vm2829_vm3, %v2798_v15  ;;  %v3761_v23 = vadd.f32 %v2615_v22, %v1144_v6  ;;  %v3729_v58 = vpop.f32.mrb[6].mxu0 }
 0x1dd   : > { %v2771_v25 = vadd.f32 %v3760_v16, %v4748_v59  ;;  %v3762_v27 = vadd.f32 %v3729_v58, %v3559_v7  ;;  %v2618_v28 = vpop.f32.mrb[7].mxu0 }
 0x1de   : > { %v2769_v40 = vadd.f32 %v3761_v23, %v4748_v59  ;;  %v3763_v41 = vadd.f32 %v2618_v28, %v1147_v17 }
 0x1df   : > { %v2803_v42 = vmax.f32 %v2771_v25, 0.0  ;;  %v2772_v45 = vadd.f32 %v3762_v27, %v4748_v59 }
 0x1e0   : > { %v2801_v46 = vmax.f32 %v2769_v40, 0.0  ;;  %v2770_v47 = vadd.f32 %v3763_v41, %v4748_v59 }
 0x1e1   : > { %2836 = vst.msk [vmem:[%s4756_s6 + $0x30] sm:$0xff] %vm2829_vm3, %v2803_v42  ;;  %v2804_v61 = vmax.f32 %v2772_v45, 0.0 }
 0x1e2   : > { %2834 = vst.msk [vmem:[%s4756_s6 + $0x20] sm:$0xff] %vm2829_vm3, %v2801_v46  ;;  %v2802_v62 = vmax.f32 %v2770_v47, 0.0  ;;  %v3732_v44 = vpop.f32.mrb[8].mxu0 }
 0x1e3   : > { %2837 = vst.msk [vmem:[%s4756_s6 + $0x38] sm:$0xff] %vm2829_vm3, %v2804_v61  ;;  %v3764_v60 = vadd.f32 %v3732_v44, %v3562_v18  ;;  %v2631_v63 = vpop.f32.mrb[9].mxu0 }
 0x1e4   : > { %2835 = vst.msk [vmem:[%s4756_s6 + $0x28] sm:$0xff] %vm2829_vm3, %v2802_v62  ;;  %v3765_v0 = vadd.f32 %v2631_v63, %v1160_v19  ;;  %v3733_v2 = vpop.f32.mrb[10].mxu0 }
 0x1e5   : > { %v2775_v14 = vadd.f32 %v3764_v60, %v4748_v59  ;;  %v3766_v8 = vadd.f32 %v3733_v2, %v3563_v20  ;;  %v2634_v21 = vpop.f32.mrb[11].mxu0 }
 0x1e6   : > { %v2773_v24 = vadd.f32 %v3765_v0, %v4748_v59  ;;  %v3767_v31 = vadd.f32 %v2634_v21, %v1163_v34 }
 0x1e7   : > { %v2807_v32 = vmax.f32 %v2775_v14, 0.0  ;;  %v2776_v37 = vadd.f32 %v3766_v8, %v4748_v59 }
 0x1e8   : > { %v2805_v38 = vmax.f32 %v2773_v24, 0.0  ;;  %v2774_v43 = vadd.f32 %v3767_v31, %v4748_v59 }
 0x1e9   : > { %2840 = vst.msk [vmem:[%s4756_s6 + $0x50] sm:$0xff] %vm2829_vm3, %v2807_v32  ;;  %v2808_v53 = vmax.f32 %v2776_v37, 0.0 }
 0x1ea   : > { %2838 = vst.msk [vmem:[%s4756_s6 + $0x40] sm:$0xff] %vm2829_vm3, %v2805_v38  ;;  %v2806_v55 = vmax.f32 %v2774_v43, 0.0  ;;  %v3736_v56 = vpop.f32.mrb[12].mxu0 }
 0x1eb   : > { %2841 = vst.msk [vmem:[%s4756_s6 + $0x58] sm:$0xff] %vm2829_vm3, %v2808_v53  ;;  %v3768_v57 = vadd.f32 %v3736_v56, %v4736_v35  ;;  %v2647_v3 = vpop.f32.mrb[13].mxu0 }
 0x1ec   : > { %2839 = vst.msk [vmem:[%s4756_s6 + $0x48] sm:$0xff] %vm2829_vm3, %v2806_v55  ;;  %v3769_v4 = vadd.f32 %v2647_v3, %v4738_v39  ;;  %v3737_v6 = vpop.f32.mrb[14].mxu0 }
 0x1ed   : > { %v2779_v7 = vadd.f32 %v3768_v57, %v4748_v59  ;;  %v3770_v17 = vadd.f32 %v3737_v6, %v4740_v50  ;;  %v2650_v18 = vpop.f32.mrb[15].mxu0 }
 0x1ee   : > { %v2777_v19 = vadd.f32 %v3769_v4, %v4748_v59  ;;  %v3771_v20 = vadd.f32 %v2650_v18, %v4742_v52 }
 0x1ef   : > { %v2811_v34 = vmax.f32 %v2779_v7, 0.0  ;;  %v2780_v35 = vadd.f32 %v3770_v17, %v4748_v59 }
 0x1f0   : > { %v2809_v54 = vmax.f32 %v2777_v19, 0.0  ;;  %v2778_v10 = vadd.f32 %v3771_v20, %v4748_v59 }
 0x1f1   : > { %2844 = vst.msk [vmem:[%s4756_s6 + $0x70] sm:$0xff] %vm2829_vm3, %v2811_v34  ;;  %v2812_v39 = vmax.f32 %v2780_v35, 0.0  ;;  %v3604_v11 = vpop.f32.mrb[16].mxu1 }
 0x1f2   : > { %2842 = vst.msk [vmem:[%s4756_s6 + $0x60] sm:$0xff] %vm2829_vm3, %v2809_v54  ;;  %v2810_v12 = vmax.f32 %v2778_v10, 0.0  ;;  %v3740_v50 = vpop.f32.mrb[16].mxu0  ;;  %v1486_v13 = vpop.f32.mrb[17].mxu1 }
 0x1f3   : > { %2845 = vst.msk [vmem:[%s4756_s6 + $0x78] sm:$0xff] %vm2829_vm3, %v2812_v39  ;;  %v3772_v29 = vadd.f32 %v3740_v50, %v3604_v11  ;;  %v2663_v52 = vpop.f32.mrb[17].mxu0  ;;  %v3605_v30 = vpop.f32.mrb[18].mxu1 }
 0x1f4   : > { %2843 = vst.msk [vmem:[%s4756_s6 + $0x68] sm:$0xff] %vm2829_vm3, %v2810_v12  ;;  %v3773_v33 = vadd.f32 %v2663_v52, %v1486_v13  ;;  %v3741_v36 = vpop.f32.mrb[18].mxu0  ;;  %v1489_v48 = vpop.f32.mrb[19].mxu1 }
 0x1f5   : > { %v2783_v49 = vadd.f32 %v3772_v29, %v4748_v59  ;;  %v3774_v51 = vadd.f32 %v3741_v36, %v3605_v30  ;;  %v2666_v1 = vpop.f32.mrb[19].mxu0 }
 0x1f6   : > { %v2781_v26 = vadd.f32 %v3773_v33, %v4748_v59  ;;  %v3775_v9 = vadd.f32 %v2666_v1, %v1489_v48 }
 0x1f7   : > { %v2815_v15 = vmax.f32 %v2783_v49, 0.0  ;;  %v2784_v5 = vadd.f32 %v3774_v51, %v4748_v59 }
 0x1f8   : > { %v2813_v16 = vmax.f32 %v2781_v26, 0.0  ;;  %v2782_v22 = vadd.f32 %v3775_v9, %v4748_v59 }
 0x1f9   : > { %2848 = vst.msk [vmem:[%s4756_s6 + $0x90] sm:$0xff] %vm2829_vm3, %v2815_v15  ;;  %v2816_v23 = vmax.f32 %v2784_v5, 0.0  ;;  %v3608_v58 = vpop.f32.mrb[20].mxu1 }
 0x1fa   : > { %2846 = vst.msk [vmem:[%s4756_s6 + $0x80] sm:$0xff] %vm2829_vm3, %v2813_v16  ;;  %v2814_v25 = vmax.f32 %v2782_v22, 0.0  ;;  %v3744_v27 = vpop.f32.mrb[20].mxu0  ;;  %v1502_v28 = vpop.f32.mrb[21].mxu1 }
 0x1fb   : > { %2849 = vst.msk [vmem:[%s4756_s6 + $0x98] sm:$0xff] %vm2829_vm3, %v2816_v23  ;;  %v3776_v40 = vadd.f32 %v3744_v27, %v3608_v58  ;;  %v2679_v41 = vpop.f32.mrb[21].mxu0  ;;  %v3609_v42 = vpop.f32.mrb[22].mxu1 }
 0x1fc   : > { %2847 = vst.msk [vmem:[%s4756_s6 + $0x88] sm:$0xff] %vm2829_vm3, %v2814_v25  ;;  %v3777_v45 = vadd.f32 %v2679_v41, %v1502_v28  ;;  %v3745_v46 = vpop.f32.mrb[22].mxu0  ;;  %v1505_v47 = vpop.f32.mrb[23].mxu1 }
 0x1fd   : > { %v2787_v61 = vadd.f32 %v3776_v40, %v4748_v59  ;;  %v3778_v62 = vadd.f32 %v3745_v46, %v3609_v42  ;;  %v2682_v44 = vpop.f32.mrb[23].mxu0 }
 0x1fe   : > { %v2785_v60 = vadd.f32 %v3777_v45, %v4748_v59  ;;  %v3779_v63 = vadd.f32 %v2682_v44, %v1505_v47 }
 0x1ff   : > { %v2819_v0 = vmax.f32 %v2787_v61, 0.0  ;;  %v2788_v2 = vadd.f32 %v3778_v62, %v4748_v59 }
 0x200   : > { %v2817_v14 = vmax.f32 %v2785_v60, 0.0  ;;  %v2786_v8 = vadd.f32 %v3779_v63, %v4748_v59 }
 0x201   : > { %2852 = vst.msk [vmem:[%s4756_s6 + $0xb0] sm:$0xff] %vm2829_vm3, %v2819_v0  ;;  %v2820_v21 = vmax.f32 %v2788_v2, 0.0  ;;  %v3612_v24 = vpop.f32.mrb[24].mxu1 }
 0x202   : > { %2850 = vst.msk [vmem:[%s4756_s6 + $0xa0] sm:$0xff] %vm2829_vm3, %v2817_v14  ;;  %v2818_v31 = vmax.f32 %v2786_v8, 0.0  ;;  %v3748_v32 = vpop.f32.mrb[24].mxu0  ;;  %v1518_v37 = vpop.f32.mrb[25].mxu1 }
 0x203   : > { %2853 = vst.msk [vmem:[%s4756_s6 + $0xb8] sm:$0xff] %vm2829_vm3, %v2820_v21  ;;  %v3780_v38 = vadd.f32 %v3748_v32, %v3612_v24  ;;  %v2695_v43 = vpop.f32.mrb[25].mxu0  ;;  %v3613_v53 = vpop.f32.mrb[26].mxu1 }
 0x204   : > { %2851 = vst.msk [vmem:[%s4756_s6 + $0xa8] sm:$0xff] %vm2829_vm3, %v2818_v31  ;;  %v3781_v55 = vadd.f32 %v2695_v43, %v1518_v37  ;;  %v3749_v56 = vpop.f32.mrb[26].mxu0  ;;  %v1521_v57 = vpop.f32.mrb[27].mxu1 }
 0x205   : > { %v2791_v3 = vadd.f32 %v3780_v38, %v4748_v59  ;;  %v3782_v4 = vadd.f32 %v3749_v56, %v3613_v53  ;;  %v2698_v6 = vpop.f32.mrb[27].mxu0 }
 0x206   : > { %v2789_v7 = vadd.f32 %v3781_v55, %v4748_v59  ;;  %v3783_v17 = vadd.f32 %v2698_v6, %v1521_v57 }
 0x207   : > { %v2823_v18 = vmax.f32 %v2791_v3, 0.0  ;;  %v2792_v19 = vadd.f32 %v3782_v4, %v4748_v59 }
 0x208   : > { %v2821_v20 = vmax.f32 %v2789_v7, 0.0  ;;  %v2790_v34 = vadd.f32 %v3783_v17, %v4748_v59 }
 0x209   : > { %2856 = vst.msk [vmem:[%s4756_s6 + $0xd0] sm:$0xff] %vm2829_vm3, %v2823_v18  ;;  %v2824_v35 = vmax.f32 %v2792_v19, 0.0  ;;  %v3616_v54 = vpop.f32.mrb[28].mxu1 }
 0x20a   : > { %2854 = vst.msk [vmem:[%s4756_s6 + $0xc0] sm:$0xff] %vm2829_vm3, %v2821_v20  ;;  %v2822_v10 = vmax.f32 %v2790_v34, 0.0  ;;  %v3752_v39 = vpop.f32.mrb[28].mxu0  ;;  %v1534_v11 = vpop.f32.mrb[29].mxu1 }
 0x20b   : > { %2857 = vst.msk [vmem:[%s4756_s6 + $0xd8] sm:$0xff] %vm2829_vm3, %v2824_v35  ;;  %v3784_v12 = vadd.f32 %v3752_v39, %v3616_v54  ;;  %v2711_v50 = vpop.f32.mrb[29].mxu0  ;;  %v3617_v13 = vpop.f32.mrb[30].mxu1 }
 0x20c   : > { %2855 = vst.msk [vmem:[%s4756_s6 + $0xc8] sm:$0xff] %vm2829_vm3, %v2822_v10  ;;  %v3785_v29 = vadd.f32 %v2711_v50, %v1534_v11  ;;  %v3753_v52 = vpop.f32.mrb[30].mxu0  ;;  %v1537_v30 = vpop.f32.mrb[31].mxu1 }
 0x20d   : > { %v2795_v33 = vadd.f32 %v3784_v12, %v4748_v59  ;;  %v3786_v36 = vadd.f32 %v3753_v52, %v3617_v13  ;;  %v2714_v48 = vpop.f32.mrb[31].mxu0 }
 0x20e   : > { %v2793_v49 = vadd.f32 %v3785_v29, %v4748_v59  ;;  %v3787_v51 = vadd.f32 %v2714_v48, %v1537_v30 }
 0x20f   : > { %v2827_v1 = vmax.f32 %v2795_v33, 0.0  ;;  %v2796_v26 = vadd.f32 %v3786_v36, %v4748_v59 }
 0x210   : > { %v2825_v9 = vmax.f32 %v2793_v49, 0.0  ;;  %v2794_v15 = vadd.f32 %v3787_v51, %v4748_v59 }
 0x211   : > { %2860 = vst.msk [vmem:[%s4756_s6 + $0xf0] sm:$0xff] %vm2829_vm3, %v2827_v1  ;;  %v2828_v5 = vmax.f32 %v2796_v26, 0.0 }
 0x212   : > { %2858 = vst.msk [vmem:[%s4756_s6 + $0xe0] sm:$0xff] %vm2829_vm3, %v2825_v9  ;;  %v2826_v16 = vmax.f32 %v2794_v15, 0.0 }
 0x213   : > { %2861 = vst.msk [vmem:[%s4756_s6 + $0xf8] sm:$0xff] %vm2829_vm3, %v2828_v5 }
 0x214   : > { %2859 = vst.msk [vmem:[%s4756_s6 + $0xe8] sm:$0xff] %vm2829_vm3, %v2826_v16 }
 0x215   : > { %4068 = shalt.err (!%p4065_p3)
}
 0x216   : > { %s4069_s25 = scalar_lea.hbm %s4853_s11, 4096  ;;  %s4073_s28 = scalar_lea.hbm %s4909_s3, 8192 }
 0x217   : > { %p4070_p4 = scmp.ne.s32.totalorder %s4853_s11, %s4069_s25  ;;  %p4074_p9 = scmp.lt.u32.totalorder %s4853_s11, %s4909_s3 }
 0x218   : > { %p4075_p10 = scmp.lt.u32.totalorder %s4073_s28, %s4069_s25  ;;  %p4077_p12 = scmp.lt.u32.totalorder %s4069_s25, %s4853_s11 }
 0x219   : > { %p4071_p7 = pnand %p4070_p4, %p4181_p5 }
 0x21a   : > { %p4076_p11 = por %p4075_p10, %p4074_p9 }
 0x21b   : > { %p4072_p8 = pneg %p4071_p7 }
 0x21c   : > { %p4078_p13 = por %p4077_p12, %p4076_p11 }
 0x21e   : > { %p4079_p0 = pnand %p4078_p13, %p4072_p8 }
 0x220   : > { %4082 = shalt.err (!%p4079_p0)
}
 0x221   : > { %s4121_s4 = smov 128   ;;  %s4122_s5 = smov 8  }
 0x222   : > { %4013 = dma.vmem_to_hbm [thread:$0]  (%p4181_p5), %s4855_s8, 4096, %s4853_s11, %s4865_s16, %s4121_s4, %s4121_s4, %s4122_s5  }
 0x223 PF: > { %p4019_p1 = scmp.ge.s32.totalorder %s4117_s15, 2  ;;  %s2891_s6 = sand.u32 1, %s4105_s12  }
 0x224   : > { %s2892_s7 = scalar_lea.sflag [#allocation3], %s2891_s6 }
 0x225   : > { %p4016_p2 = pnand %p4019_p1, %p4185_p6 }
 0x227   : > { %4100 = dma.done.wait (!%p4016_p2), %s2892_s7, 4096  }
 0x228   : > { %4102 = vsyncadd (!%p4016_p2), %s2892_s7, 4294963200  ;;  %p13_p3 = scmp.ge.s32.totalorder %s4168_s18, 4   ;;  %s4912_s12 = smov %s4109_s13 }
 0x229   : > { %s4913_s13 = smov %s4113_s14  ;;  %s4914_s14 = smov %s4179_s21 }
 0x22a   : > { %s4915_s15 = smov %s4168_s18  ;;  %15 = sbr.rel (!%p13_p3) target bundleno = 3 (0x3), region = 77 }
 0x231   :  { %2897 = vsyncpa [#allocation3], 1 }
 0x232   :  { %2899 = vsyncpa [#allocation3 + $0x1], 1 }

</bundles_post_ra>
